<compile_context>
chip_gen: v7x
topology: tpu7x:2x2x1
jax: 0.10.0
libtpu: 0.0.40
codegen_flags: <defaults>
</compile_context>

<pallas_src>
import functools
import math
import re

import jax
import jax.numpy as jnp
from jax.experimental import pallas as pl
from jax.experimental.pallas import tpu as pltpu


# ----------------------- per-generation tuning -----------------------

def _detect_tuning():
    kind = ""
    try:
        kind = jax.devices()[0].device_kind.lower()
    except Exception:
        pass
    m = re.search(r"v(\d+)", kind)
    ver = int(m.group(1)) if m else 0
    if ver in (4, 5, 6):
        # 128 MiB physical VMEM: big tiles, generous limit.
        return 96 * 1024 * 1024, 512, 512
    # v7x (64 MiB / TensorCore) or unknown: conservative.
    return 48 * 1024 * 1024, 512, 256


_VMEM_LIMIT, _TM, _TM_MLP = _detect_tuning()


def _cp(sems):
    return pltpu.CompilerParams(dimension_semantics=sems,
                                vmem_limit_bytes=_VMEM_LIMIT)


def _const(shape):
    """Grid-invariant block (1-D grid): constant index map + single buffer."""
    zeros = (0,) * len(shape)
    return pl.BlockSpec(shape, lambda i, _z=zeros: _z, pipeline_mode=pl.Buffered(1))


def _pick_head_pack(heads, dh):
    """Smallest divisor hp of heads with hp*dh lane-aligned (128); else all heads."""
    for hp in range(1, heads + 1):
        if heads % hp == 0 and (hp * dh) % 128 == 0:
            return hp
    return heads


# ----------------------- Pallas kernels -----------------------

def _matmul_bias_kernel(a_ref, w_ref, bias_ref, o_ref):
    acc = jnp.dot(a_ref[...], w_ref[...], preferred_element_type=jnp.float32)
    o_ref[...] = (acc + bias_ref[...]).astype(o_ref.dtype)


def _ln_matmul_kernel(x_ref, g_ref, b_ref, w_ref, bias_ref, o_ref):
    # LayerNorm in f32, matmul in bf16 with f32 accumulation.
    x = x_ref[...].astype(jnp.float32)
    mu = jnp.mean(x, axis=-1, keepdims=True)
    xc = x - mu
    var = jnp.mean(xc * xc, axis=-1, keepdims=True)
    y = (xc * jax.lax.rsqrt(var + 1e-5)) * g_ref[...] + b_ref[...]
    acc = jnp.dot(y.astype(jnp.bfloat16), w_ref[...], preferred_element_type=jnp.float32)
    o_ref[...] = (acc + bias_ref[...]).astype(o_ref.dtype)


def _ln_qkv_kernel(x_ref, g_ref, b_ref, w_ref, bias_ref, o_ref, *, dh):
    """ln1 + fused QKV projection; output written head-separated (3H, tm, dh)."""
    x = x_ref[...].astype(jnp.float32)
    mu = jnp.mean(x, axis=-1, keepdims=True)
    xc = x - mu
    var = jnp.mean(xc * xc, axis=-1, keepdims=True)
    y = (xc * jax.lax.rsqrt(var + 1e-5)) * g_ref[...] + b_ref[...]
    acc = jnp.dot(y.astype(jnp.bfloat16), w_ref[...],
                  preferred_element_type=jnp.float32) + bias_ref[...]
    acc = acc.astype(o_ref.dtype)
    # Per-head slab stores: lane slices here are hidden under the 3*D*D MXU work,
    # and they keep the attention kernel free of sub-vreg lane slicing.
    n_slabs = o_ref.shape[0]          # 3 * heads
    for j in range(n_slabs):
        o_ref[j] = acc[:, j * dh:(j + 1) * dh]


def _attn_kernel(q_ref, k_ref, v_ref, o_ref, *, hp, n_valid):
    """q/k/v refs: (hp, Lp, dh) — heads indexed on a leading dim (no lane slices).

    Output: (1, Lp, hp*dh) lane-dense packed heads.  1/sqrt(dh) is pre-folded
    into q.  Padded keys (>= n_valid) are masked out of the softmax.
    TODO(synk): flash-style KV tiling for very long sequences.
    """
    Lp = q_ref.shape[1]
    neg = None
    if n_valid < Lp:
        key_idx = jax.lax.broadcasted_iota(jnp.int32, (1, Lp), 1)
        neg = jnp.where(key_idx >= n_valid, -1e30, 0.0)
    outs = []
    for j in range(hp):               # static unrolled per-head loop
        q = q_ref[j]                  # (Lp, dh) bf16
        k = k_ref[j]
        v = v_ref[j]
        s = jax.lax.dot_general(q, k, (((1,), (1,)), ((), ())),
                                preferred_element_type=jnp.float32)
        if neg is not None:
            s = s + neg
        m = jnp.max(s, axis=-1, keepdims=True)
        p = jnp.exp(s - m)
        inv = pl.reciprocal(jnp.sum(p, axis=-1, keepdims=True), approx=True)
        p = (p * inv).astype(v.dtype)
        outs.append(jnp.dot(p, v, preferred_element_type=jnp.float32))
    o_ref[0] = jnp.concatenate(outs, axis=-1).astype(o_ref.dtype)


def _proj_mlp_kernel(a_ref, x_ref, ow_ref, ob_ref, g_ref, b_ref,
                     w1_ref, b1_ref, w2_ref, b2_ref, o_ref):
    """attention out-proj + bias + residual + ln2 + fc + QuickGELU + proj + residual."""
    t = (jnp.dot(a_ref[...], ow_ref[...], preferred_element_type=jnp.float32)
         + ob_ref[...] + x_ref[...].astype(jnp.float32))
    mu = jnp.mean(t, axis=-1, keepdims=True)
    tc = t - mu
    var = jnp.mean(tc * tc, axis=-1, keepdims=True)
    y = (tc * jax.lax.rsqrt(var + 1e-5)) * g_ref[...] + b_ref[...]
    h = jnp.dot(y.astype(jnp.bfloat16), w1_ref[...],
                preferred_element_type=jnp.float32) + b1_ref[...]
    h = h * jax.nn.sigmoid(1.702 * h)          # QuickGELU (OpenAI CLIP)
    out = jnp.dot(h.astype(jnp.bfloat16), w2_ref[...],
                  preferred_element_type=jnp.float32) + b2_ref[...]
    o_ref[...] = (out + t).astype(o_ref.dtype)


def _cls_pos_ln_kernel(tok_ref, cls_ref, pos_ref, g_ref, b_ref, o_ref):
    """CLS concat + positional embedding + ln_pre, batched over G frames."""
    g = g_ref[...]
    b = b_ref[...]

    def ln(x):
        mu = jnp.mean(x, axis=-1, keepdims=True)
        xc = x - mu
        var = jnp.mean(xc * xc, axis=-1, keepdims=True)
        return (xc * jax.lax.rsqrt(var + 1e-5)) * g + b

    G = tok_ref.shape[0]
    D = tok_ref.shape[2]
    cls_row = cls_ref[...].astype(jnp.float32) + pos_ref[0:1, :]      # (1, D)
    cls_out = ln(cls_row).astype(o_ref.dtype)
    o_ref[:, 0:1, :] = jnp.broadcast_to(cls_out[None], (G, 1, D))
    patches = tok_ref[...].astype(jnp.float32) + pos_ref[1:, :][None]  # (G, n_p, D)
    o_ref[:, 1:, :] = ln(patches).astype(o_ref.dtype)


# ----------------------- kernel wrappers -----------------------

def matmul_bias(a, w, bias=None, out_dtype=jnp.bfloat16):
    M, K = a.shape
    N = w.shape[1]
    if bias is None:
        bias = jnp.zeros((1, N), jnp.float32)
    tm = M if M <= _TM else _TM
    nt = pl.cdiv(M, tm)
    return pl.pallas_call(
        _matmul_bias_kernel,
        grid=(nt,),
        in_specs=[pl.BlockSpec((tm, K), lambda i: (i, 0)),
                  _const((K, N)), _const((1, N))],
        out_specs=pl.BlockSpec((tm, N), lambda i: (i, 0)),
        out_shape=jax.ShapeDtypeStruct((M, N), out_dtype),
        compiler_params=_cp(("parallel",)),
    )(a, w, bias)


def ln_matmul(x, g, b, w, bias, out_dtype=jnp.bfloat16):
    M, D = x.shape
    N = w.shape[1]
    tm = M if M <= _TM else _TM
    nt = pl.cdiv(M, tm)
    return pl.pallas_call(
        _ln_matmul_kernel,
        grid=(nt,),
        in_specs=[pl.BlockSpec((tm, D), lambda i: (i, 0)),
                  _const((1, D)), _const((1, D)),
                  _const((D, N)), _const((1, N))],
        out_specs=pl.BlockSpec((tm, N), lambda i: (i, 0)),
        out_shape=jax.ShapeDtypeStruct((M, N), out_dtype),
        compiler_params=_cp(("parallel",)),
    )(x, g, b, w, bias)


def ln_qkv_proj(x, g, b, w, bias, heads, dh):
    """x: (M, D) -> head-separated QKV buffer (3*heads, M, dh) bf16."""
    M, D = x.shape
    N3 = w.shape[1]
    tm = M if M <= _TM else _TM
    nt = pl.cdiv(M, tm)
    kern = functools.partial(_ln_qkv_kernel, dh=dh)
    return pl.pallas_call(
        kern,
        grid=(nt,),
        in_specs=[pl.BlockSpec((tm, D), lambda i: (i, 0)),
                  _const((1, D)), _const((1, D)),
                  _const((D, N3)), _const((1, N3))],
        out_specs=pl.BlockSpec((3 * heads, tm, dh), lambda i: (0, i, 0)),
        out_shape=jax.ShapeDtypeStruct((3 * heads, M, dh), jnp.bfloat16),
        compiler_params=_cp(("parallel",)),
    )(x, g, b, w, bias)


def attention(qkv, B, Lp, heads, dh, hp, n_valid):
    """qkv: (3*heads, B*Lp, dh) bf16 -> (B, Lp, heads*dh) bf16 (lane-packed heads)."""
    ng = heads // hp
    hpd = hp * dh
    D = heads * dh
    kern = functools.partial(_attn_kernel, hp=hp, n_valid=n_valid)
    return pl.pallas_call(
        kern,
        grid=(B, ng),
        in_specs=[pl.BlockSpec((hp, Lp, dh), lambda b, g: (g, b, 0)),
                  pl.BlockSpec((hp, Lp, dh), lambda b, g, _ng=ng: (_ng + g, b, 0)),
                  pl.BlockSpec((hp, Lp, dh), lambda b, g, _ng=ng: (2 * _ng + g, b, 0))],
        out_specs=pl.BlockSpec((1, Lp, hpd), lambda b, g: (b, 0, g)),
        out_shape=jax.ShapeDtypeStruct((B, Lp, D), jnp.bfloat16),
        compiler_params=_cp(("parallel", "parallel")),
    )(qkv, qkv, qkv)


def outproj_mlp(attn, x, ow, ob, g, b, w1, b1, w2, b2):
    M, D = x.shape
    Dh = w1.shape[1]
    tm = M if M <= _TM_MLP else _TM_MLP
    nt = pl.cdiv(M, tm)
    return pl.pallas_call(
        _proj_mlp_kernel,
        grid=(nt,),
        in_specs=[pl.BlockSpec((tm, D), lambda i: (i, 0)),
                  pl.BlockSpec((tm, D), lambda i: (i, 0)),
                  _const((D, D)), _const((1, D)),
                  _const((1, D)), _const((1, D)),
                  _const((D, Dh)), _const((1, Dh)),
                  _const((Dh, D)), _const((1, D))],
        out_specs=pl.BlockSpec((tm, D), lambda i: (i, 0)),
        out_shape=jax.ShapeDtypeStruct((M, D), jnp.bfloat16),
        compiler_params=_cp(("parallel",)),
    )(attn, x, ow, ob, g, b, w1, b1, w2, b2)


def add_cls_pos_ln(tokens, cls, pos, g, b):
    """tokens: (BT, n_p, D) bf16 -> (BT, 1+n_p, D) bf16 = ln_pre(concat(cls, tok) + pos)."""
    BT, n_p, D = tokens.shape
    Lf = 1 + n_p
    G = BT if BT <= 8 else 8
    nt = pl.cdiv(BT, G)
    return pl.pallas_call(
        _cls_pos_ln_kernel,
        grid=(nt,),
        in_specs=[pl.BlockSpec((G, n_p, D), lambda i: (i, 0, 0)),
                  _const((1, D)),
                  _const((Lf, D)),
                  _const((1, D)), _const((1, D))],
        out_specs=pl.BlockSpec((G, Lf, D), lambda i: (i, 0, 0)),
        out_shape=jax.ShapeDtypeStruct((BT, Lf, D), jnp.bfloat16),
        compiler_params=_cp(("parallel",)),
    )(tokens, cls, pos, g, b)


# ----------------------- parameters -----------------------

def init_params(key, cfg):
    """PyTorch-layout float32 parameters (same as the reference module)."""
    width = cfg["width"]
    patch = cfg["patch"]
    in_ch = cfg["in_ch"]
    grid = cfg["image"] // patch
    n_patches = grid * grid
    counter = [0]

    def nrm(shape, std=0.02):
        counter[0] += 1
        k = jax.random.fold_in(key, counter[0])
        return jax.random.normal(k, shape, jnp.float32) * std

    params = dict(
        conv1_w=nrm((width, in_ch, patch, patch)),          # (O, I, kh, kw), no bias
        class_embedding=nrm((width,)),
        positional_embedding=nrm((1 + n_patches, width)),
        syno_embedding=nrm((cfg["num_synos"], width)),
        ln_pre_g=jnp.ones((width,), jnp.float32),
        ln_pre_b=jnp.zeros((width,), jnp.float32),
        ln_post_g=jnp.ones((width,), jnp.float32),
        ln_post_b=jnp.zeros((width,), jnp.float32),
        proj=nrm((width, cfg["output_dim"])),
        blocks=[],
    )
    for _ in range(cfg["layers"]):
        params["blocks"].append(dict(
            ln1_g=jnp.ones((width,), jnp.float32), ln1_b=jnp.zeros((width,), jnp.float32),
            in_w=nrm((3 * width, width)), in_b=jnp.zeros((3 * width,), jnp.float32),
            out_w=nrm((width, width)), out_b=jnp.zeros((width,), jnp.float32),
            ln2_g=jnp.ones((width,), jnp.float32), ln2_b=jnp.zeros((width,), jnp.float32),
            fc_w=nrm((4 * width, width)), fc_b=jnp.zeros((4 * width,), jnp.float32),
            proj_w=nrm((width, 4 * width)), proj_b=jnp.zeros((width,), jnp.float32),
        ))
    return params


def prepare_params(params, cfg):
    """Pre-transpose / pre-scale / pre-cast all weights once (bf16 MXU operands)."""
    width = cfg["width"]
    heads = cfg["heads"]
    patch = cfg["patch"]
    in_ch = cfg["in_ch"]
    dh = width // heads
    hp = _pick_head_pack(heads, dh)
    bf16 = jnp.bfloat16
    scale = 1.0 / math.sqrt(dh)

    # patch-embed weight: (O, I, p, p) -> (K, width); K padded to multiple of 256
    K = in_ch * patch * patch
    Kp = ((K + 255) // 256) * 256
    w_patch = params["conv1_w"].reshape(width, K).T
    if Kp != K:
        w_patch = jnp.pad(w_patch, ((0, Kp - K), (0, 0)))

    # final projection: pad output dim to a lane-dense multiple of 128
    out_dim = cfg["output_dim"]
    Np = ((out_dim + 127) // 128) * 128
    proj = params["proj"]
    if Np != out_dim:
        proj = jnp.pad(proj, ((0, 0), (0, Np - out_dim)))

    prep = dict(
        hp=hp, dh=dh, patch_k=K,
        w_patch=w_patch.astype(bf16),
        class_embedding=params["class_embedding"].reshape(1, width).astype(bf16),
        positional_embedding=params["positional_embedding"].astype(jnp.float32),
        syno_embedding=params["syno_embedding"].astype(bf16),
        ln_pre_g=params["ln_pre_g"].reshape(1, width),
        ln_pre_b=params["ln_pre_b"].reshape(1, width),
        ln_post_g=params["ln_post_g"].reshape(1, width),
        ln_post_b=params["ln_post_b"].reshape(1, width),
        proj=proj.astype(bf16),
        proj_bias=jnp.zeros((1, Np), jnp.float32),
        blocks=[],
    )
    for blk in params["blocks"]:
        qkv_w = blk["in_w"].T                                   # (D, 3D)
        qkv_w = jnp.concatenate([qkv_w[:, :width] * scale, qkv_w[:, width:]],
                                axis=1).astype(bf16)            # fold 1/sqrt(dh) into q
        qkv_b = jnp.concatenate([blk["in_b"][:width] * scale, blk["in_b"][width:]])
        prep["blocks"].append(dict(
            ln1_g=blk["ln1_g"].reshape(1, width), ln1_b=blk["ln1_b"].reshape(1, width),
            qkv_w=qkv_w, qkv_b=qkv_b.reshape(1, -1).astype(jnp.float32),
            out_w=blk["out_w"].T.astype(bf16),
            out_b=blk["out_b"].reshape(1, width).astype(jnp.float32),
            ln2_g=blk["ln2_g"].reshape(1, width), ln2_b=blk["ln2_b"].reshape(1, width),
            fc_w=blk["fc_w"].T.astype(bf16),
            fc_b=blk["fc_b"].reshape(1, -1).astype(jnp.float32),
            cproj_w=blk["proj_w"].T.astype(bf16),
            cproj_b=blk["proj_b"].reshape(1, width).astype(jnp.float32),
        ))
    return prep


# ----------------------- forward -----------------------

def resblock(seq, blk, heads, dh, hp, n_valid):
    B, Lp, D = seq.shape
    M = B * Lp
    x2 = seq.reshape(M, D)
    # ln1 + fused QKV projection, head-separated output
    qkv = ln_qkv_proj(x2, blk["ln1_g"], blk["ln1_b"], blk["qkv_w"], blk["qkv_b"], heads, dh)
    # multi-head attention (padded keys masked), lane-packed output
    attn = attention(qkv, B, Lp, heads, dh, hp, n_valid)
    # out-proj + bias + residual + ln2 + MLP (QuickGELU) + residual (one kernel)
    out = outproj_mlp(attn.reshape(M, D), x2, blk["out_w"], blk["out_b"],
                      blk["ln2_g"], blk["ln2_b"], blk["fc_w"], blk["fc_b"],
                      blk["cproj_w"], blk["cproj_b"])
    return out.reshape(B, Lp, D)


def video_attr_extractor_forward(x, prep, cfg):
    """x: (B, T, C, H, W) float32 -> dict(layer_attrs, embeds, synos)."""
    B, T, C, H, W = x.shape
    patch, width, heads = cfg["patch"], cfg["width"], cfg["heads"]
    dh, hp = prep["dh"], prep["hp"]
    gh, gw = H // patch, W // patch
    n_p = gh * gw
    Lf = 1 + n_p

    # patch embedding: conv(kernel=stride=patch, no bias) == per-patch matmul
    xf = x.reshape(B * T, C, gh, patch, gw, patch)
    xf = xf.transpose(0, 2, 4, 1, 3, 5).reshape(B * T * n_p, C * patch * patch)
    K, Kp = prep["patch_k"], prep["w_patch"].shape[0]
    if Kp != K:
        xf = jnp.pad(xf, ((0, 0), (0, Kp - K)))
    tokens = matmul_bias(xf.astype(jnp.bfloat16), prep["w_patch"])
    tokens = tokens.reshape(B * T, n_p, width)

    # class token concat + positional embedding + ln_pre (single fused kernel)
    tokens = add_cls_pos_ln(tokens, prep["class_embedding"], prep["positional_embedding"],
                            prep["ln_pre_g"], prep["ln_pre_b"])       # (B*T, Lf, width)

    frames = tokens.reshape(B, T * Lf, width)
    S = prep["syno_embedding"].shape[0]
    # TODO(synk): syno tokens bypass ln_pre / positional embedding (exact repo routing unknown)
    syno = jnp.broadcast_to(prep["syno_embedding"][None], (B, S, width))
    seq = jnp.concatenate([frames, syno], axis=1)                     # (B, L, width) bf16
    L = T * Lf + S
    Lp = ((L + 7) // 8) * 8
    if Lp != L:
        # one-time pad kept across all layers; padded keys are masked in attention
        seq = jnp.pad(seq, ((0, 0), (0, Lp - L), (0, 0)))

    layer_attrs = []
    for blk in prep["blocks"]:
        seq = resblock(seq, blk, heads, dh, hp, L)
        layer_attrs.append({})   # store_attrs=[] and attn_record=False -> nothing stored

    # gather CLS + syno tokens (drops padding), fused ln_post + projection
    cls_idx = jnp.arange(T) * Lf
    cls_tokens = seq[:, cls_idx, :]                                   # (B, T, width)
    syno_tokens = seq[:, T * Lf:T * Lf + S, :]                        # (B, S, width)
    pooled = jnp.concatenate([cls_tokens, syno_tokens], axis=1).reshape(B * (T + S), width)
    out = ln_matmul(pooled, prep["ln_post_g"], prep["ln_post_b"],
                    prep["proj"], prep["proj_bias"], out_dtype=jnp.float32)
    out = out[:, :cfg["output_dim"]].reshape(B, T + S, cfg["output_dim"])
    embeds = out[:, :T]
    synos = out[:, T:]
    return dict(layer_attrs=layer_attrs, embeds=embeds, synos=synos)


if __name__ == "__main__":
    cfg = dict(image=16, patch=8, in_ch=3, width=32, heads=4,
               layers=2, num_synos=1, output_dim=16)
    root = jax.random.PRNGKey(0)
    params = init_params(jax.random.fold_in(root, 123), cfg)
    prep = prepare_params(params, cfg)

    B, T = 2, 2
    x = jax.random.normal(jax.random.fold_in(root, 7),
                          (B, T, cfg["in_ch"], cfg["image"], cfg["image"]), jnp.float32)

    fwd = jax.jit(lambda inp: video_attr_extractor_forward(inp, prep, cfg))
    out = fwd(x)
    jax.block_until_ready(out["embeds"])
    jax.block_until_ready(out["synos"])

    assert out["embeds"].shape == (B, T, cfg["output_dim"])
    assert out["synos"].shape == (B, cfg["num_synos"], cfg["output_dim"])
    assert len(out["layer_attrs"]) == cfg["layers"]
    assert bool(jnp.all(jnp.isfinite(out["embeds"]))) and bool(jnp.all(jnp.isfinite(out["synos"])))
    print("KERNEL_OK")
</pallas_src>

<mosaic_0001>
module attributes {stable_mosaic.version = 11 : i64} {
  func.func @_cls_pos_ln_kernel(%arg0: i32, %arg1: memref<4x4x32xbf16, #tpu.memory_space<vmem>>, %arg2: memref<1x32xbf16, #tpu.memory_space<vmem>>, %arg3: memref<5x32xf32, #tpu.memory_space<vmem>>, %arg4: memref<1x32xf32, #tpu.memory_space<vmem>>, %arg5: memref<1x32xf32, #tpu.memory_space<vmem>>, %arg6: memref<4x5x32xbf16, #tpu.memory_space<vmem>>) attributes {dimension_semantics = [#tpu.dimension_semantics<parallel>], iteration_bounds = array<i64: 1>, scalar_prefetch = 0 : i64, scratch_operands = 0 : i64, tpu.core_type = #tpu.core_type<tc>, window_params = [{transform_indices = @transform_0, window_bounds = array<i64: 4, 4, 32>}, {pipeline_mode = #tpu.pipeline_mode<synchronous>, transform_indices = @transform_1, window_bounds = array<i64: 1, 32>}, {pipeline_mode = #tpu.pipeline_mode<synchronous>, transform_indices = @transform_2, window_bounds = array<i64: 5, 32>}, {pipeline_mode = #tpu.pipeline_mode<synchronous>, transform_indices = @transform_3, window_bounds = array<i64: 1, 32>}, {pipeline_mode = #tpu.pipeline_mode<synchronous>, transform_indices = @transform_4, window_bounds = array<i64: 1, 32>}, {transform_indices = @transform_5, window_bounds = array<i64: 4, 5, 32>}]} {
    %c0 = arith.constant 0 : index
    %c0_0 = arith.constant 0 : index
    %0 = vector.load %arg4[%c0, %c0_0] : memref<1x32xf32, #tpu.memory_space<vmem>>, vector<1x32xf32>
    %c0_1 = arith.constant 0 : index
    %c0_2 = arith.constant 0 : index
    %1 = vector.load %arg5[%c0_1, %c0_2] : memref<1x32xf32, #tpu.memory_space<vmem>>, vector<1x32xf32>
    %c0_3 = arith.constant 0 : index
    %c0_4 = arith.constant 0 : index
    %2 = vector.load %arg2[%c0_3, %c0_4] : memref<1x32xbf16, #tpu.memory_space<vmem>>, vector<1x32xbf16>
    %3 = arith.extf %2 : vector<1x32xbf16> to vector<1x32xf32>
    %c0_5 = arith.constant 0 : index
    %c0_6 = arith.constant 0 : index
    %4 = vector.load %arg3[%c0_5, %c0_6] : memref<5x32xf32, #tpu.memory_space<vmem>>, vector<1x32xf32>
    %5 = arith.addf %3, %4 : vector<1x32xf32>
    %cst = arith.constant dense<0.000000e+00> : vector<1xf32>
    %6 = vector.multi_reduction <add>, %5, %cst [1] : vector<1x32xf32> to vector<1xf32>
    %7 = vector.shape_cast %6 : vector<1xf32> to vector<1x1xf32>
    %cst_7 = arith.constant 3.200000e+01 : f32
    %8 = vector.broadcast %cst_7 : f32 to vector<1x1xf32>
    %9 = arith.divf %7, %8 : vector<1x1xf32>
    %10 = vector.broadcast %9 : vector<1x1xf32> to vector<1x32xf32>
    %11 = arith.subf %5, %10 : vector<1x32xf32>
    %12 = arith.mulf %11, %11 : vector<1x32xf32>
    %cst_8 = arith.constant dense<0.000000e+00> : vector<1xf32>
    %13 = vector.multi_reduction <add>, %12, %cst_8 [1] : vector<1x32xf32> to vector<1xf32>
    %14 = vector.shape_cast %13 : vector<1xf32> to vector<1x1xf32>
    %cst_9 = arith.constant 3.200000e+01 : f32
    %15 = vector.broadcast %cst_9 : f32 to vector<1x1xf32>
    %16 = arith.divf %14, %15 : vector<1x1xf32>
    %cst_10 = arith.constant 9.99999974E-6 : f32
    %17 = vector.broadcast %cst_10 : f32 to vector<1x1xf32>
    %18 = arith.addf %16, %17 : vector<1x1xf32>
    %19 = math.rsqrt %18 : vector<1x1xf32>
    %20 = vector.broadcast %19 : vector<1x1xf32> to vector<1x32xf32>
    %21 = arith.mulf %11, %20 : vector<1x32xf32>
    %22 = arith.mulf %21, %0 : vector<1x32xf32>
    %23 = arith.addf %22, %1 : vector<1x32xf32>
    %24 = arith.truncf %23 : vector<1x32xf32> to vector<1x32xbf16>
    %25 = vector.shape_cast %24 : vector<1x32xbf16> to vector<1x1x32xbf16>
    %26 = vector.shape_cast %25 : vector<1x1x32xbf16> to vector<1x1x32xbf16>
    %27 = vector.broadcast %26 : vector<1x1x32xbf16> to vector<4x1x32xbf16>
    %c0_11 = arith.constant 0 : index
    %c0_12 = arith.constant 0 : index
    %c0_13 = arith.constant 0 : index
    %28 = vector.load %arg6[%c0_11, %c0_12, %c0_13] : memref<4x5x32xbf16, #tpu.memory_space<vmem>>, vector<4x1x32xbf16>
    tpu.vector_store %arg6[%c0_11, %c0_12, %c0_13], %27 {strides = array<i32>} : memref<4x5x32xbf16, #tpu.memory_space<vmem>>, vector<4x1x32xbf16>,
    %c0_14 = arith.constant 0 : index
    %c0_15 = arith.constant 0 : index
    %c0_16 = arith.constant 0 : index
    %29 = vector.load %arg1[%c0_14, %c0_15, %c0_16] : memref<4x4x32xbf16, #tpu.memory_space<vmem>>, vector<4x4x32xbf16>
    %30 = arith.extf %29 : vector<4x4x32xbf16> to vector<4x4x32xf32>
    %c1 = arith.constant 1 : index
    %c0_17 = arith.constant 0 : index
    %31 = vector.load %arg3[%c1, %c0_17] : memref<5x32xf32, #tpu.memory_space<vmem>>, vector<4x32xf32>
    %32 = vector.shape_cast %31 : vector<4x32xf32> to vector<1x4x32xf32>
    %33 = vector.broadcast %32 : vector<1x4x32xf32> to vector<4x4x32xf32>
    %34 = arith.addf %30, %33 : vector<4x4x32xf32>
    %cst_18 = arith.constant dense<0.000000e+00> : vector<4x4xf32>
    %35 = vector.multi_reduction <add>, %34, %cst_18 [2] : vector<4x4x32xf32> to vector<4x4xf32>
    %36 = vector.shape_cast %35 : vector<4x4xf32> to vector<4x4x1xf32>
    %cst_19 = arith.constant 3.200000e+01 : f32
    %37 = vector.broadcast %cst_19 : f32 to vector<4x4x1xf32>
    %38 = arith.divf %36, %37 : vector<4x4x1xf32>
    %39 = vector.broadcast %38 : vector<4x4x1xf32> to vector<4x4x32xf32>
    %40 = arith.subf %34, %39 : vector<4x4x32xf32>
    %41 = arith.mulf %40, %40 : vector<4x4x32xf32>
    %cst_20 = arith.constant dense<0.000000e+00> : vector<4x4xf32>
    %42 = vector.multi_reduction <add>, %41, %cst_20 [2] : vector<4x4x32xf32> to vector<4x4xf32>
    %43 = vector.shape_cast %42 : vector<4x4xf32> to vector<4x4x1xf32>
    %cst_21 = arith.constant 3.200000e+01 : f32
    %44 = vector.broadcast %cst_21 : f32 to vector<4x4x1xf32>
    %45 = arith.divf %43, %44 : vector<4x4x1xf32>
    %cst_22 = arith.constant 9.99999974E-6 : f32
    %46 = vector.broadcast %cst_22 : f32 to vector<4x4x1xf32>
    %47 = arith.addf %45, %46 : vector<4x4x1xf32>
    %48 = math.rsqrt %47 : vector<4x4x1xf32>
    %49 = vector.broadcast %48 : vector<4x4x1xf32> to vector<4x4x32xf32>
    %50 = arith.mulf %40, %49 : vector<4x4x32xf32>
    %51 = vector.shape_cast %0 : vector<1x32xf32> to vector<1x1x32xf32>
    %52 = vector.broadcast %51 : vector<1x1x32xf32> to vector<4x4x32xf32>
    %53 = arith.mulf %50, %52 : vector<4x4x32xf32>
    %54 = vector.shape_cast %1 : vector<1x32xf32> to vector<1x1x32xf32>
    %55 = vector.broadcast %54 : vector<1x1x32xf32> to vector<4x4x32xf32>
    %56 = arith.addf %53, %55 : vector<4x4x32xf32>
    %57 = arith.truncf %56 : vector<4x4x32xf32> to vector<4x4x32xbf16>
    %c0_23 = arith.constant 0 : index
    %c1_24 = arith.constant 1 : index
    %c0_25 = arith.constant 0 : index
    %58 = vector.load %arg6[%c0_23, %c1_24, %c0_25] : memref<4x5x32xbf16, #tpu.memory_space<vmem>>, vector<4x4x32xbf16>
    tpu.vector_store %arg6[%c0_23, %c1_24, %c0_25], %57 {strides = array<i32>} : memref<4x5x32xbf16, #tpu.memory_space<vmem>>, vector<4x4x32xbf16>,
    return
  }
  func.func @transform_0(%arg0: i32) -> (i32, i32, i32) {
    %c0_i32 = arith.constant 0 : i32
    %c0_i32_0 = arith.constant 0 : i32
    %c0_i32_1 = arith.constant 0 : i32
    return %arg0, %c0_i32, %c0_i32_0 : i32, i32, i32
  }
  func.func @transform_1(%arg0: i32) -> (i32, i32) {
    %c0_i32 = arith.constant 0 : i32
    %c0_i32_0 = arith.constant 0 : i32
    %c0_i32_1 = arith.constant 0 : i32
    return %c0_i32, %c0_i32_0 : i32, i32
  }
  func.func @transform_2(%arg0: i32) -> (i32, i32) {
    %c0_i32 = arith.constant 0 : i32
    %c0_i32_0 = arith.constant 0 : i32
    %c0_i32_1 = arith.constant 0 : i32
    return %c0_i32, %c0_i32_0 : i32, i32
  }
  func.func @transform_3(%arg0: i32) -> (i32, i32) {
    %c0_i32 = arith.constant 0 : i32
    %c0_i32_0 = arith.constant 0 : i32
    %c0_i32_1 = arith.constant 0 : i32
    return %c0_i32, %c0_i32_0 : i32, i32
  }
  func.func @transform_4(%arg0: i32) -> (i32, i32) {
    %c0_i32 = arith.constant 0 : i32
    %c0_i32_0 = arith.constant 0 : i32
    %c0_i32_1 = arith.constant 0 : i32
    return %c0_i32, %c0_i32_0 : i32, i32
  }
  func.func @transform_5(%arg0: i32) -> (i32, i32, i32) {
    %c0_i32 = arith.constant 0 : i32
    %c0_i32_0 = arith.constant 0 : i32
    %c0_i32_1 = arith.constant 0 : i32
    return %arg0, %c0_i32, %c0_i32_0 : i32, i32, i32
  }
}

module attributes {stable_mosaic.version = 11 : i64} {
  func.func @_matmul_bias_kernel(%arg0: i32, %arg1: memref<16x256xbf16, #tpu.memory_space<vmem>>, %arg2: memref<256x32xbf16, #tpu.memory_space<vmem>>, %arg3: memref<1x32xf32, #tpu.memory_space<vmem>>, %arg4: memref<16x32xbf16, #tpu.memory_space<vmem>>) attributes {dimension_semantics = [#tpu.dimension_semantics<parallel>], iteration_bounds = array<i64: 1>, scalar_prefetch = 0 : i64, scratch_operands = 0 : i64, tpu.core_type = #tpu.core_type<tc>, window_params = [{transform_indices = @transform_0, window_bounds = array<i64: 16, 256>}, {pipeline_mode = #tpu.pipeline_mode<synchronous>, transform_indices = @transform_1, window_bounds = array<i64: 256, 32>}, {pipeline_mode = #tpu.pipeline_mode<synchronous>, transform_indices = @transform_2, window_bounds = array<i64: 1, 32>}, {transform_indices = @transform_3, window_bounds = array<i64: 16, 32>}]} {
    %c0 = arith.constant 0 : index
    %c0_0 = arith.constant 0 : index
    %0 = vector.load %arg1[%c0, %c0_0] : memref<16x256xbf16, #tpu.memory_space<vmem>>, vector<16x256xbf16>
    %c0_1 = arith.constant 0 : index
    %c0_2 = arith.constant 0 : index
    %1 = vector.load %arg2[%c0_1, %c0_2] : memref<256x32xbf16, #tpu.memory_space<vmem>>, vector<256x32xbf16>
    %cst = arith.constant dense<0.000000e+00> : vector<16x32xf32>
    %2 = tpu.matmul %0, %1, %cst {dimension_numbers = #tpu.dot_dimension_numbers<[1], [0], [0], [1], [0, 0, 1, 1], [], []>} : vector<16x256xbf16>, vector<256x32xbf16>, vector<16x32xf32> -> vector<16x32xf32>
    %c0_3 = arith.constant 0 : index
    %c0_4 = arith.constant 0 : index
    %3 = vector.load %arg3[%c0_3, %c0_4] : memref<1x32xf32, #tpu.memory_space<vmem>>, vector<1x32xf32>
    %4 = vector.broadcast %3 : vector<1x32xf32> to vector<16x32xf32>
    %5 = arith.addf %2, %4 : vector<16x32xf32>
    %6 = arith.truncf %5 : vector<16x32xf32> to vector<16x32xbf16>
    %c0_5 = arith.constant 0 : index
    %c0_6 = arith.constant 0 : index
    %7 = vector.load %arg4[%c0_5, %c0_6] : memref<16x32xbf16, #tpu.memory_space<vmem>>, vector<16x32xbf16>
    tpu.vector_store %arg4[%c0_5, %c0_6], %6 {strides = array<i32>} : memref<16x32xbf16, #tpu.memory_space<vmem>>, vector<16x32xbf16>,
    return
  }
  func.func @transform_0(%arg0: i32) -> (i32, i32) {
    %c0_i32 = arith.constant 0 : i32
    %c0_i32_0 = arith.constant 0 : i32
    return %arg0, %c0_i32 : i32, i32
  }
  func.func @transform_1(%arg0: i32) -> (i32, i32) {
    %c0_i32 = arith.constant 0 : i32
    %c0_i32_0 = arith.constant 0 : i32
    %c0_i32_1 = arith.constant 0 : i32
    return %c0_i32, %c0_i32_0 : i32, i32
  }
  func.func @transform_2(%arg0: i32) -> (i32, i32) {
    %c0_i32 = arith.constant 0 : i32
    %c0_i32_0 = arith.constant 0 : i32
    %c0_i32_1 = arith.constant 0 : i32
    return %c0_i32, %c0_i32_0 : i32, i32
  }
  func.func @transform_3(%arg0: i32) -> (i32, i32) {
    %c0_i32 = arith.constant 0 : i32
    %c0_i32_0 = arith.constant 0 : i32
    return %arg0, %c0_i32 : i32, i32
  }
}

module attributes {stable_mosaic.version = 11 : i64} {
  func.func @_attn_kernel(%arg0: i32, %arg1: i32, %arg2: memref<4x16x8xbf16, #tpu.memory_space<vmem>>, %arg3: memref<4x16x8xbf16, #tpu.memory_space<vmem>>, %arg4: memref<4x16x8xbf16, #tpu.memory_space<vmem>>, %arg5: memref<1x16x32xbf16, #tpu.memory_space<vmem>>) attributes {dimension_semantics = [#tpu.dimension_semantics<parallel>, #tpu.dimension_semantics<parallel>], iteration_bounds = array<i64: 2, 1>, scalar_prefetch = 0 : i64, scratch_operands = 0 : i64, tpu.core_type = #tpu.core_type<tc>, window_params = [{transform_indices = @transform_0, window_bounds = array<i64: 4, 16, 8>}, {transform_indices = @transform_1, window_bounds = array<i64: 4, 16, 8>}, {transform_indices = @transform_2, window_bounds = array<i64: 4, 16, 8>}, {transform_indices = @transform_3, window_bounds = array<i64: 1, 16, 32>}]} {
    %0 = tpu.iota {dimensions = array<i32: 1>} : vector<1x16xi32>
    %c11_i32 = arith.constant 11 : i32
    %1 = vector.broadcast %c11_i32 : i32 to vector<1x16xi32>
    %2 = arith.cmpi sge, %0, %1 : vector<1x16xi32>
    %cst = arith.constant -1.000000e+30 : f32
    %cst_0 = arith.constant 0.000000e+00 : f32
    %3 = vector.broadcast %cst : f32 to vector<1x16xf32>
    %4 = vector.broadcast %cst_0 : f32 to vector<1x16xf32>
    %5 = arith.select %2, %3, %4 : vector<1x16xi1>, vector<1x16xf32>
    %c0 = arith.constant 0 : index
    %c0_1 = arith.constant 0 : index
    %c0_2 = arith.constant 0 : index
    %6 = vector.load %arg2[%c0, %c0_1, %c0_2] : memref<4x16x8xbf16, #tpu.memory_space<vmem>>, vector<1x16x8xbf16>
    %7 = vector.shape_cast %6 : vector<1x16x8xbf16> to vector<16x8xbf16>
    %c0_3 = arith.constant 0 : index
    %c0_4 = arith.constant 0 : index
    %c0_5 = arith.constant 0 : index
    %8 = vector.load %arg3[%c0_3, %c0_4, %c0_5] : memref<4x16x8xbf16, #tpu.memory_space<vmem>>, vector<1x16x8xbf16>
    %9 = vector.shape_cast %8 : vector<1x16x8xbf16> to vector<16x8xbf16>
    %c0_6 = arith.constant 0 : index
    %c0_7 = arith.constant 0 : index
    %c0_8 = arith.constant 0 : index
    %10 = vector.load %arg4[%c0_6, %c0_7, %c0_8] : memref<4x16x8xbf16, #tpu.memory_space<vmem>>, vector<1x16x8xbf16>
    %11 = vector.shape_cast %10 : vector<1x16x8xbf16> to vector<16x8xbf16>
    %cst_9 = arith.constant dense<0.000000e+00> : vector<16x16xf32>
    %12 = tpu.matmul %7, %9, %cst_9 {dimension_numbers = #tpu.dot_dimension_numbers<[1], [1], [0], [0], [0, 0, 1, 0], [], []>} : vector<16x8xbf16>, vector<16x8xbf16>, vector<16x16xf32> -> vector<16x16xf32>
    %13 = vector.broadcast %5 : vector<1x16xf32> to vector<16x16xf32>
    %14 = arith.addf %12, %13 : vector<16x16xf32>
    %cst_10 = arith.constant dense<0xFF800000> : vector<16xf32>
    %15 = vector.multi_reduction <maximumf>, %14, %cst_10 [1] : vector<16x16xf32> to vector<16xf32>
    %16 = vector.shape_cast %15 : vector<16xf32> to vector<16x1xf32>
    %17 = vector.broadcast %16 : vector<16x1xf32> to vector<16x16xf32>
    %18 = arith.subf %14, %17 : vector<16x16xf32>
    %19 = math.exp %18 : vector<16x16xf32>
    %cst_11 = arith.constant dense<0.000000e+00> : vector<16xf32>
    %20 = vector.multi_reduction <add>, %19, %cst_11 [1] : vector<16x16xf32> to vector<16xf32>
    %21 = vector.shape_cast %20 : vector<16xf32> to vector<16x1xf32>
    %22 = tpu.reciprocal %21 {approx = true} : vector<16x1xf32> -> vector<16x1xf32>
    %23 = vector.broadcast %22 : vector<16x1xf32> to vector<16x16xf32>
    %24 = arith.mulf %19, %23 : vector<16x16xf32>
    %25 = arith.truncf %24 : vector<16x16xf32> to vector<16x16xbf16>
    %cst_12 = arith.constant dense<0.000000e+00> : vector<16x8xf32>
    %26 = tpu.matmul %25, %11, %cst_12 {dimension_numbers = #tpu.dot_dimension_numbers<[1], [0], [0], [1], [0, 0, 1, 1], [], []>} : vector<16x16xbf16>, vector<16x8xbf16>, vector<16x8xf32> -> vector<16x8xf32>
    %c1 = arith.constant 1 : index
    %c0_13 = arith.constant 0 : index
    %c0_14 = arith.constant 0 : index
    %27 = vector.load %arg2[%c1, %c0_13, %c0_14] : memref<4x16x8xbf16, #tpu.memory_space<vmem>>, vector<1x16x8xbf16>
    %28 = vector.shape_cast %27 : vector<1x16x8xbf16> to vector<16x8xbf16>
    %c1_15 = arith.constant 1 : index
    %c0_16 = arith.constant 0 : index
    %c0_17 = arith.constant 0 : index
    %29 = vector.load %arg3[%c1_15, %c0_16, %c0_17] : memref<4x16x8xbf16, #tpu.memory_space<vmem>>, vector<1x16x8xbf16>
    %30 = vector.shape_cast %29 : vector<1x16x8xbf16> to vector<16x8xbf16>
    %c1_18 = arith.constant 1 : index
    %c0_19 = arith.constant 0 : index
    %c0_20 = arith.constant 0 : index
    %31 = vector.load %arg4[%c1_18, %c0_19, %c0_20] : memref<4x16x8xbf16, #tpu.memory_space<vmem>>, vector<1x16x8xbf16>
    %32 = vector.shape_cast %31 : vector<1x16x8xbf16> to vector<16x8xbf16>
    %cst_21 = arith.constant dense<0.000000e+00> : vector<16x16xf32>
    %33 = tpu.matmul %28, %30, %cst_21 {dimension_numbers = #tpu.dot_dimension_numbers<[1], [1], [0], [0], [0, 0, 1, 0], [], []>} : vector<16x8xbf16>, vector<16x8xbf16>, vector<16x16xf32> -> vector<16x16xf32>
    %34 = vector.broadcast %5 : vector<1x16xf32> to vector<16x16xf32>
    %35 = arith.addf %33, %34 : vector<16x16xf32>
    %cst_22 = arith.constant dense<0xFF800000> : vector<16xf32>
    %36 = vector.multi_reduction <maximumf>, %35, %cst_22 [1] : vector<16x16xf32> to vector<16xf32>
    %37 = vector.shape_cast %36 : vector<16xf32> to vector<16x1xf32>
    %38 = vector.broadcast %37 : vector<16x1xf32> to vector<16x16xf32>
    %39 = arith.subf %35, %38 : vector<16x16xf32>
    %40 = math.exp %39 : vector<16x16xf32>
    %cst_23 = arith.constant dense<0.000000e+00> : vector<16xf32>
    %41 = vector.multi_reduction <add>, %40, %cst_23 [1] : vector<16x16xf32> to vector<16xf32>
    %42 = vector.shape_cast %41 : vector<16xf32> to vector<16x1xf32>
    %43 = tpu.reciprocal %42 {approx = true} : vector<16x1xf32> -> vector<16x1xf32>
    %44 = vector.broadcast %43 : vector<16x1xf32> to vector<16x16xf32>
    %45 = arith.mulf %40, %44 : vector<16x16xf32>
    %46 = arith.truncf %45 : vector<16x16xf32> to vector<16x16xbf16>
    %cst_24 = arith.constant dense<0.000000e+00> : vector<16x8xf32>
    %47 = tpu.matmul %46, %32, %cst_24 {dimension_numbers = #tpu.dot_dimension_numbers<[1], [0], [0], [1], [0, 0, 1, 1], [], []>} : vector<16x16xbf16>, vector<16x8xbf16>, vector<16x8xf32> -> vector<16x8xf32>
    %c2 = arith.constant 2 : index
    %c0_25 = arith.constant 0 : index
    %c0_26 = arith.constant 0 : index
    %48 = vector.load %arg2[%c2, %c0_25, %c0_26] : memref<4x16x8xbf16, #tpu.memory_space<vmem>>, vector<1x16x8xbf16>
    %49 = vector.shape_cast %48 : vector<1x16x8xbf16> to vector<16x8xbf16>
    %c2_27 = arith.constant 2 : index
    %c0_28 = arith.constant 0 : index
    %c0_29 = arith.constant 0 : index
    %50 = vector.load %arg3[%c2_27, %c0_28, %c0_29] : memref<4x16x8xbf16, #tpu.memory_space<vmem>>, vector<1x16x8xbf16>
    %51 = vector.shape_cast %50 : vector<1x16x8xbf16> to vector<16x8xbf16>
    %c2_30 = arith.constant 2 : index
    %c0_31 = arith.constant 0 : index
    %c0_32 = arith.constant 0 : index
    %52 = vector.load %arg4[%c2_30, %c0_31, %c0_32] : memref<4x16x8xbf16, #tpu.memory_space<vmem>>, vector<1x16x8xbf16>
    %53 = vector.shape_cast %52 : vector<1x16x8xbf16> to vector<16x8xbf16>
    %cst_33 = arith.constant dense<0.000000e+00> : vector<16x16xf32>
    %54 = tpu.matmul %49, %51, %cst_33 {dimension_numbers = #tpu.dot_dimension_numbers<[1], [1], [0], [0], [0, 0, 1, 0], [], []>} : vector<16x8xbf16>, vector<16x8xbf16>, vector<16x16xf32> -> vector<16x16xf32>
    %55 = vector.broadcast %5 : vector<1x16xf32> to vector<16x16xf32>
    %56 = arith.addf %54, %55 : vector<16x16xf32>
    %cst_34 = arith.constant dense<0xFF800000> : vector<16xf32>
    %57 = vector.multi_reduction <maximumf>, %56, %cst_34 [1] : vector<16x16xf32> to vector<16xf32>
    %58 = vector.shape_cast %57 : vector<16xf32> to vector<16x1xf32>
    %59 = vector.broadcast %58 : vector<16x1xf32> to vector<16x16xf32>
    %60 = arith.subf %56, %59 : vector<16x16xf32>
    %61 = math.exp %60 : vector<16x16xf32>
    %cst_35 = arith.constant dense<0.000000e+00> : vector<16xf32>
    %62 = vector.multi_reduction <add>, %61, %cst_35 [1] : vector<16x16xf32> to vector<16xf32>
    %63 = vector.shape_cast %62 : vector<16xf32> to vector<16x1xf32>
    %64 = tpu.reciprocal %63 {approx = true} : vector<16x1xf32> -> vector<16x1xf32>
    %65 = vector.broadcast %64 : vector<16x1xf32> to vector<16x16xf32>
    %66 = arith.mulf %61, %65 : vector<16x16xf32>
    %67 = arith.truncf %66 : vector<16x16xf32> to vector<16x16xbf16>
    %cst_36 = arith.constant dense<0.000000e+00> : vector<16x8xf32>
    %68 = tpu.matmul %67, %53, %cst_36 {dimension_numbers = #tpu.dot_dimension_numbers<[1], [0], [0], [1], [0, 0, 1, 1], [], []>} : vector<16x16xbf16>, vector<16x8xbf16>, vector<16x8xf32> -> vector<16x8xf32>
    %c3 = arith.constant 3 : index
    %c0_37 = arith.constant 0 : index
    %c0_38 = arith.constant 0 : index
    %69 = vector.load %arg2[%c3, %c0_37, %c0_38] : memref<4x16x8xbf16, #tpu.memory_space<vmem>>, vector<1x16x8xbf16>
    %70 = vector.shape_cast %69 : vector<1x16x8xbf16> to vector<16x8xbf16>
    %c3_39 = arith.constant 3 : index
    %c0_40 = arith.constant 0 : index
    %c0_41 = arith.constant 0 : index
    %71 = vector.load %arg3[%c3_39, %c0_40, %c0_41] : memref<4x16x8xbf16, #tpu.memory_space<vmem>>, vector<1x16x8xbf16>
    %72 = vector.shape_cast %71 : vector<1x16x8xbf16> to vector<16x8xbf16>
    %c3_42 = arith.constant 3 : index
    %c0_43 = arith.constant 0 : index
    %c0_44 = arith.constant 0 : index
    %73 = vector.load %arg4[%c3_42, %c0_43, %c0_44] : memref<4x16x8xbf16, #tpu.memory_space<vmem>>, vector<1x16x8xbf16>
    %74 = vector.shape_cast %73 : vector<1x16x8xbf16> to vector<16x8xbf16>
    %cst_45 = arith.constant dense<0.000000e+00> : vector<16x16xf32>
    %75 = tpu.matmul %70, %72, %cst_45 {dimension_numbers = #tpu.dot_dimension_numbers<[1], [1], [0], [0], [0, 0, 1, 0], [], []>} : vector<16x8xbf16>, vector<16x8xbf16>, vector<16x16xf32> -> vector<16x16xf32>
    %76 = vector.broadcast %5 : vector<1x16xf32> to vector<16x16xf32>
    %77 = arith.addf %75, %76 : vector<16x16xf32>
    %cst_46 = arith.constant dense<0xFF800000> : vector<16xf32>
    %78 = vector.multi_reduction <maximumf>, %77, %cst_46 [1] : vector<16x16xf32> to vector<16xf32>
    %79 = vector.shape_cast %78 : vector<16xf32> to vector<16x1xf32>
    %80 = vector.broadcast %79 : vector<16x1xf32> to vector<16x16xf32>
    %81 = arith.subf %77, %80 : vector<16x16xf32>
    %82 = math.exp %81 : vector<16x16xf32>
    %cst_47 = arith.constant dense<0.000000e+00> : vector<16xf32>
    %83 = vector.multi_reduction <add>, %82, %cst_47 [1] : vector<16x16xf32> to vector<16xf32>
    %84 = vector.shape_cast %83 : vector<16xf32> to vector<16x1xf32>
    %85 = tpu.reciprocal %84 {approx = true} : vector<16x1xf32> -> vector<16x1xf32>
    %86 = vector.broadcast %85 : vector<16x1xf32> to vector<16x16xf32>
    %87 = arith.mulf %82, %86 : vector<16x16xf32>
    %88 = arith.truncf %87 : vector<16x16xf32> to vector<16x16xbf16>
    %cst_48 = arith.constant dense<0.000000e+00> : vector<16x8xf32>
    %89 = tpu.matmul %88, %74, %cst_48 {dimension_numbers = #tpu.dot_dimension_numbers<[1], [0], [0], [1], [0, 0, 1, 1], [], []>} : vector<16x16xbf16>, vector<16x8xbf16>, vector<16x8xf32> -> vector<16x8xf32>
    %90 = tpu.concatenate %26, %47, %68, %89 in 1 : vector<16x8xf32>, vector<16x8xf32>, vector<16x8xf32>, vector<16x8xf32> -> vector<16x32xf32>
    %91 = arith.truncf %90 : vector<16x32xf32> to vector<16x32xbf16>
    %c0_49 = arith.constant 0 : index
    %c0_50 = arith.constant 0 : index
    %c0_51 = arith.constant 0 : index
    %92 = vector.load %arg5[%c0_49, %c0_50, %c0_51] : memref<1x16x32xbf16, #tpu.memory_space<vmem>>, vector<1x16x32xbf16>
    %93 = vector.shape_cast %92 : vector<1x16x32xbf16> to vector<16x32xbf16>
    %94 = vector.shape_cast %91 : vector<16x32xbf16> to vector<1x16x32xbf16>
    tpu.vector_store %arg5[%c0_49, %c0_50, %c0_51], %94 {strides = array<i32>} : memref<1x16x32xbf16, #tpu.memory_space<vmem>>, vector<1x16x32xbf16>,
    return
  }
  func.func @transform_0(%arg0: i32, %arg1: i32) -> (i32, i32, i32) {
    %c0_i32 = arith.constant 0 : i32
    %c0_i32_0 = arith.constant 0 : i32
    return %arg1, %arg0, %c0_i32 : i32, i32, i32
  }
  func.func @transform_1(%arg0: i32, %arg1: i32) -> (i32, i32, i32) {
    %c1_i32 = arith.constant 1 : i32
    %0 = arith.addi %c1_i32, %arg1 : i32
    %c0_i32 = arith.constant 0 : i32
    %c0_i32_0 = arith.constant 0 : i32
    return %0, %arg0, %c0_i32 : i32, i32, i32
  }
  func.func @transform_2(%arg0: i32, %arg1: i32) -> (i32, i32, i32) {
    %c2_i32 = arith.constant 2 : i32
    %0 = arith.addi %c2_i32, %arg1 : i32
    %c0_i32 = arith.constant 0 : i32
    %c0_i32_0 = arith.constant 0 : i32
    return %0, %arg0, %c0_i32 : i32, i32, i32
  }
  func.func @transform_3(%arg0: i32, %arg1: i32) -> (i32, i32, i32) {
    %c0_i32 = arith.constant 0 : i32
    %c0_i32_0 = arith.constant 0 : i32
    return %arg0, %c0_i32, %arg1 : i32, i32, i32
  }
}

module attributes {stable_mosaic.version = 11 : i64} {
  func.func @_ln_qkv_kernel(%arg0: i32, %arg1: memref<32x32xbf16, #tpu.memory_space<vmem>>, %arg2: memref<1x32xf32, #tpu.memory_space<vmem>>, %arg3: memref<1x32xf32, #tpu.memory_space<vmem>>, %arg4: memref<32x96xbf16, #tpu.memory_space<vmem>>, %arg5: memref<1x96xf32, #tpu.memory_space<vmem>>, %arg6: memref<12x32x8xbf16, #tpu.memory_space<vmem>>) attributes {dimension_semantics = [#tpu.dimension_semantics<parallel>], iteration_bounds = array<i64: 1>, scalar_prefetch = 0 : i64, scratch_operands = 0 : i64, tpu.core_type = #tpu.core_type<tc>, window_params = [{transform_indices = @transform_0, window_bounds = array<i64: 32, 32>}, {pipeline_mode = #tpu.pipeline_mode<synchronous>, transform_indices = @transform_1, window_bounds = array<i64: 1, 32>}, {pipeline_mode = #tpu.pipeline_mode<synchronous>, transform_indices = @transform_2, window_bounds = array<i64: 1, 32>}, {pipeline_mode = #tpu.pipeline_mode<synchronous>, transform_indices = @transform_3, window_bounds = array<i64: 32, 96>}, {pipeline_mode = #tpu.pipeline_mode<synchronous>, transform_indices = @transform_4, window_bounds = array<i64: 1, 96>}, {transform_indices = @transform_5, window_bounds = array<i64: 12, 32, 8>}]} {
    %c0 = arith.constant 0 : index
    %c0_0 = arith.constant 0 : index
    %0 = vector.load %arg1[%c0, %c0_0] : memref<32x32xbf16, #tpu.memory_space<vmem>>, vector<32x32xbf16>
    %1 = arith.extf %0 : vector<32x32xbf16> to vector<32x32xf32>
    %cst = arith.constant dense<0.000000e+00> : vector<32xf32>
    %2 = vector.multi_reduction <add>, %1, %cst [1] : vector<32x32xf32> to vector<32xf32>
    %3 = vector.shape_cast %2 : vector<32xf32> to vector<32x1xf32>
    %cst_1 = arith.constant 3.200000e+01 : f32
    %4 = vector.broadcast %cst_1 : f32 to vector<32x1xf32>
    %5 = arith.divf %3, %4 : vector<32x1xf32>
    %6 = vector.broadcast %5 : vector<32x1xf32> to vector<32x32xf32>
    %7 = arith.subf %1, %6 : vector<32x32xf32>
    %8 = arith.mulf %7, %7 : vector<32x32xf32>
    %cst_2 = arith.constant dense<0.000000e+00> : vector<32xf32>
    %9 = vector.multi_reduction <add>, %8, %cst_2 [1] : vector<32x32xf32> to vector<32xf32>
    %10 = vector.shape_cast %9 : vector<32xf32> to vector<32x1xf32>
    %cst_3 = arith.constant 3.200000e+01 : f32
    %11 = vector.broadcast %cst_3 : f32 to vector<32x1xf32>
    %12 = arith.divf %10, %11 : vector<32x1xf32>
    %cst_4 = arith.constant 9.99999974E-6 : f32
    %13 = vector.broadcast %cst_4 : f32 to vector<32x1xf32>
    %14 = arith.addf %12, %13 : vector<32x1xf32>
    %15 = math.rsqrt %14 : vector<32x1xf32>
    %16 = vector.broadcast %15 : vector<32x1xf32> to vector<32x32xf32>
    %17 = arith.mulf %7, %16 : vector<32x32xf32>
    %c0_5 = arith.constant 0 : index
    %c0_6 = arith.constant 0 : index
    %18 = vector.load %arg2[%c0_5, %c0_6] : memref<1x32xf32, #tpu.memory_space<vmem>>, vector<1x32xf32>
    %19 = vector.broadcast %18 : vector<1x32xf32> to vector<32x32xf32>
    %20 = arith.mulf %17, %19 : vector<32x32xf32>
    %c0_7 = arith.constant 0 : index
    %c0_8 = arith.constant 0 : index
    %21 = vector.load %arg3[%c0_7, %c0_8] : memref<1x32xf32, #tpu.memory_space<vmem>>, vector<1x32xf32>
    %22 = vector.broadcast %21 : vector<1x32xf32> to vector<32x32xf32>
    %23 = arith.addf %20, %22 : vector<32x32xf32>
    %24 = arith.truncf %23 : vector<32x32xf32> to vector<32x32xbf16>
    %c0_9 = arith.constant 0 : index
    %c0_10 = arith.constant 0 : index
    %25 = vector.load %arg4[%c0_9, %c0_10] : memref<32x96xbf16, #tpu.memory_space<vmem>>, vector<32x96xbf16>
    %cst_11 = arith.constant dense<0.000000e+00> : vector<32x96xf32>
    %26 = tpu.matmul %24, %25, %cst_11 {dimension_numbers = #tpu.dot_dimension_numbers<[1], [0], [0], [1], [0, 0, 1, 1], [], []>} : vector<32x32xbf16>, vector<32x96xbf16>, vector<32x96xf32> -> vector<32x96xf32>
    %c0_12 = arith.constant 0 : index
    %c0_13 = arith.constant 0 : index
    %27 = vector.load %arg5[%c0_12, %c0_13] : memref<1x96xf32, #tpu.memory_space<vmem>>, vector<1x96xf32>
    %28 = vector.broadcast %27 : vector<1x96xf32> to vector<32x96xf32>
    %29 = arith.addf %26, %28 : vector<32x96xf32>
    %30 = arith.truncf %29 : vector<32x96xf32> to vector<32x96xbf16>
    %31 = vector.extract_strided_slice %30 {offsets = [0, 0], sizes = [32, 8], strides = [1, 1]} : vector<32x96xbf16> to vector<32x8xbf16>
    %c0_14 = arith.constant 0 : index
    %c0_15 = arith.constant 0 : index
    %c0_16 = arith.constant 0 : index
    %32 = vector.load %arg6[%c0_14, %c0_15, %c0_16] : memref<12x32x8xbf16, #tpu.memory_space<vmem>>, vector<1x32x8xbf16>
    %33 = vector.shape_cast %32 : vector<1x32x8xbf16> to vector<32x8xbf16>
    %34 = vector.shape_cast %31 : vector<32x8xbf16> to vector<1x32x8xbf16>
    tpu.vector_store %arg6[%c0_14, %c0_15, %c0_16], %34 {strides = array<i32>} : memref<12x32x8xbf16, #tpu.memory_space<vmem>>, vector<1x32x8xbf16>,
    %35 = vector.extract_strided_slice %30 {offsets = [0, 8], sizes = [32, 8], strides = [1, 1]} : vector<32x96xbf16> to vector<32x8xbf16>
    %c1 = arith.constant 1 : index
    %c0_17 = arith.constant 0 : index
    %c0_18 = arith.constant 0 : index
    %36 = vector.load %arg6[%c1, %c0_17, %c0_18] : memref<12x32x8xbf16, #tpu.memory_space<vmem>>, vector<1x32x8xbf16>
    %37 = vector.shape_cast %36 : vector<1x32x8xbf16> to vector<32x8xbf16>
    %38 = vector.shape_cast %35 : vector<32x8xbf16> to vector<1x32x8xbf16>
    tpu.vector_store %arg6[%c1, %c0_17, %c0_18], %38 {strides = array<i32>} : memref<12x32x8xbf16, #tpu.memory_space<vmem>>, vector<1x32x8xbf16>,
    %39 = vector.extract_strided_slice %30 {offsets = [0, 16], sizes = [32, 8], strides = [1, 1]} : vector<32x96xbf16> to vector<32x8xbf16>
    %c2 = arith.constant 2 : index
    %c0_19 = arith.constant 0 : index
    %c0_20 = arith.constant 0 : index
    %40 = vector.load %arg6[%c2, %c0_19, %c0_20] : memref<12x32x8xbf16, #tpu.memory_space<vmem>>, vector<1x32x8xbf16>
    %41 = vector.shape_cast %40 : vector<1x32x8xbf16> to vector<32x8xbf16>
    %42 = vector.shape_cast %39 : vector<32x8xbf16> to vector<1x32x8xbf16>
    tpu.vector_store %arg6[%c2, %c0_19, %c0_20], %42 {strides = array<i32>} : memref<12x32x8xbf16, #tpu.memory_space<vmem>>, vector<1x32x8xbf16>,
    %43 = vector.extract_strided_slice %30 {offsets = [0, 24], sizes = [32, 8], strides = [1, 1]} : vector<32x96xbf16> to vector<32x8xbf16>
    %c3 = arith.constant 3 : index
    %c0_21 = arith.constant 0 : index
    %c0_22 = arith.constant 0 : index
    %44 = vector.load %arg6[%c3, %c0_21, %c0_22] : memref<12x32x8xbf16, #tpu.memory_space<vmem>>, vector<1x32x8xbf16>
    %45 = vector.shape_cast %44 : vector<1x32x8xbf16> to vector<32x8xbf16>
    %46 = vector.shape_cast %43 : vector<32x8xbf16> to vector<1x32x8xbf16>
    tpu.vector_store %arg6[%c3, %c0_21, %c0_22], %46 {strides = array<i32>} : memref<12x32x8xbf16, #tpu.memory_space<vmem>>, vector<1x32x8xbf16>,
    %47 = vector.extract_strided_slice %30 {offsets = [0, 32], sizes = [32, 8], strides = [1, 1]} : vector<32x96xbf16> to vector<32x8xbf16>
    %c4 = arith.constant 4 : index
    %c0_23 = arith.constant 0 : index
    %c0_24 = arith.constant 0 : index
    %48 = vector.load %arg6[%c4, %c0_23, %c0_24] : memref<12x32x8xbf16, #tpu.memory_space<vmem>>, vector<1x32x8xbf16>
    %49 = vector.shape_cast %48 : vector<1x32x8xbf16> to vector<32x8xbf16>
    %50 = vector.shape_cast %47 : vector<32x8xbf16> to vector<1x32x8xbf16>
    tpu.vector_store %arg6[%c4, %c0_23, %c0_24], %50 {strides = array<i32>} : memref<12x32x8xbf16, #tpu.memory_space<vmem>>, vector<1x32x8xbf16>,
    %51 = vector.extract_strided_slice %30 {offsets = [0, 40], sizes = [32, 8], strides = [1, 1]} : vector<32x96xbf16> to vector<32x8xbf16>
    %c5 = arith.constant 5 : index
    %c0_25 = arith.constant 0 : index
    %c0_26 = arith.constant 0 : index
    %52 = vector.load %arg6[%c5, %c0_25, %c0_26] : memref<12x32x8xbf16, #tpu.memory_space<vmem>>, vector<1x32x8xbf16>
    %53 = vector.shape_cast %52 : vector<1x32x8xbf16> to vector<32x8xbf16>
    %54 = vector.shape_cast %51 : vector<32x8xbf16> to vector<1x32x8xbf16>
    tpu.vector_store %arg6[%c5, %c0_25, %c0_26], %54 {strides = array<i32>} : memref<12x32x8xbf16, #tpu.memory_space<vmem>>, vector<1x32x8xbf16>,
    %55 = vector.extract_strided_slice %30 {offsets = [0, 48], sizes = [32, 8], strides = [1, 1]} : vector<32x96xbf16> to vector<32x8xbf16>
    %c6 = arith.constant 6 : index
    %c0_27 = arith.constant 0 : index
    %c0_28 = arith.constant 0 : index
    %56 = vector.load %arg6[%c6, %c0_27, %c0_28] : memref<12x32x8xbf16, #tpu.memory_space<vmem>>, vector<1x32x8xbf16>
    %57 = vector.shape_cast %56 : vector<1x32x8xbf16> to vector<32x8xbf16>
    %58 = vector.shape_cast %55 : vector<32x8xbf16> to vector<1x32x8xbf16>
    tpu.vector_store %arg6[%c6, %c0_27, %c0_28], %58 {strides = array<i32>} : memref<12x32x8xbf16, #tpu.memory_space<vmem>>, vector<1x32x8xbf16>,
    %59 = vector.extract_strided_slice %30 {offsets = [0, 56], sizes = [32, 8], strides = [1, 1]} : vector<32x96xbf16> to vector<32x8xbf16>
    %c7 = arith.constant 7 : index
    %c0_29 = arith.constant 0 : index
    %c0_30 = arith.constant 0 : index
    %60 = vector.load %arg6[%c7, %c0_29, %c0_30] : memref<12x32x8xbf16, #tpu.memory_space<vmem>>, vector<1x32x8xbf16>
    %61 = vector.shape_cast %60 : vector<1x32x8xbf16> to vector<32x8xbf16>
    %62 = vector.shape_cast %59 : vector<32x8xbf16> to vector<1x32x8xbf16>
    tpu.vector_store %arg6[%c7, %c0_29, %c0_30], %62 {strides = array<i32>} : memref<12x32x8xbf16, #tpu.memory_space<vmem>>, vector<1x32x8xbf16>,
    %63 = vector.extract_strided_slice %30 {offsets = [0, 64], sizes = [32, 8], strides = [1, 1]} : vector<32x96xbf16> to vector<32x8xbf16>
    %c8 = arith.constant 8 : index
    %c0_31 = arith.constant 0 : index
    %c0_32 = arith.constant 0 : index
    %64 = vector.load %arg6[%c8, %c0_31, %c0_32] : memref<12x32x8xbf16, #tpu.memory_space<vmem>>, vector<1x32x8xbf16>
    %65 = vector.shape_cast %64 : vector<1x32x8xbf16> to vector<32x8xbf16>
    %66 = vector.shape_cast %63 : vector<32x8xbf16> to vector<1x32x8xbf16>
    tpu.vector_store %arg6[%c8, %c0_31, %c0_32], %66 {strides = array<i32>} : memref<12x32x8xbf16, #tpu.memory_space<vmem>>, vector<1x32x8xbf16>,
    %67 = vector.extract_strided_slice %30 {offsets = [0, 72], sizes = [32, 8], strides = [1, 1]} : vector<32x96xbf16> to vector<32x8xbf16>
    %c9 = arith.constant 9 : index
    %c0_33 = arith.constant 0 : index
    %c0_34 = arith.constant 0 : index
    %68 = vector.load %arg6[%c9, %c0_33, %c0_34] : memref<12x32x8xbf16, #tpu.memory_space<vmem>>, vector<1x32x8xbf16>
    %69 = vector.shape_cast %68 : vector<1x32x8xbf16> to vector<32x8xbf16>
    %70 = vector.shape_cast %67 : vector<32x8xbf16> to vector<1x32x8xbf16>
    tpu.vector_store %arg6[%c9, %c0_33, %c0_34], %70 {strides = array<i32>} : memref<12x32x8xbf16, #tpu.memory_space<vmem>>, vector<1x32x8xbf16>,
    %71 = vector.extract_strided_slice %30 {offsets = [0, 80], sizes = [32, 8], strides = [1, 1]} : vector<32x96xbf16> to vector<32x8xbf16>
    %c10 = arith.constant 10 : index
    %c0_35 = arith.constant 0 : index
    %c0_36 = arith.constant 0 : index
    %72 = vector.load %arg6[%c10, %c0_35, %c0_36] : memref<12x32x8xbf16, #tpu.memory_space<vmem>>, vector<1x32x8xbf16>
    %73 = vector.shape_cast %72 : vector<1x32x8xbf16> to vector<32x8xbf16>
    %74 = vector.shape_cast %71 : vector<32x8xbf16> to vector<1x32x8xbf16>
    tpu.vector_store %arg6[%c10, %c0_35, %c0_36], %74 {strides = array<i32>} : memref<12x32x8xbf16, #tpu.memory_space<vmem>>, vector<1x32x8xbf16>,
    %75 = vector.extract_strided_slice %30 {offsets = [0, 88], sizes = [32, 8], strides = [1, 1]} : vector<32x96xbf16> to vector<32x8xbf16>
    %c11 = arith.constant 11 : index
    %c0_37 = arith.constant 0 : index
    %c0_38 = arith.constant 0 : index
    %76 = vector.load %arg6[%c11, %c0_37, %c0_38] : memref<12x32x8xbf16, #tpu.memory_space<vmem>>, vector<1x32x8xbf16>
    %77 = vector.shape_cast %76 : vector<1x32x8xbf16> to vector<32x8xbf16>
    %78 = vector.shape_cast %75 : vector<32x8xbf16> to vector<1x32x8xbf16>
    tpu.vector_store %arg6[%c11, %c0_37, %c0_38], %78 {strides = array<i32>} : memref<12x32x8xbf16, #tpu.memory_space<vmem>>, vector<1x32x8xbf16>,
    return
  }
  func.func @transform_0(%arg0: i32) -> (i32, i32) {
    %c0_i32 = arith.constant 0 : i32
    %c0_i32_0 = arith.constant 0 : i32
    return %arg0, %c0_i32 : i32, i32
  }
  func.func @transform_1(%arg0: i32) -> (i32, i32) {
    %c0_i32 = arith.constant 0 : i32
    %c0_i32_0 = arith.constant 0 : i32
    %c0_i32_1 = arith.constant 0 : i32
    return %c0_i32, %c0_i32_0 : i32, i32
  }
  func.func @transform_2(%arg0: i32) -> (i32, i32) {
    %c0_i32 = arith.constant 0 : i32
    %c0_i32_0 = arith.constant 0 : i32
    %c0_i32_1 = arith.constant 0 : i32
    return %c0_i32, %c0_i32_0 : i32, i32
  }
  func.func @transform_3(%arg0: i32) -> (i32, i32) {
    %c0_i32 = arith.constant 0 : i32
    %c0_i32_0 = arith.constant 0 : i32
    %c0_i32_1 = arith.constant 0 : i32
    return %c0_i32, %c0_i32_0 : i32, i32
  }
  func.func @transform_4(%arg0: i32) -> (i32, i32) {
    %c0_i32 = arith.constant 0 : i32
    %c0_i32_0 = arith.constant 0 : i32
    %c0_i32_1 = arith.constant 0 : i32
    return %c0_i32, %c0_i32_0 : i32, i32
  }
  func.func @transform_5(%arg0: i32) -> (i32, i32, i32) {
    %c0_i32 = arith.constant 0 : i32
    %c0_i32_0 = arith.constant 0 : i32
    %c0_i32_1 = arith.constant 0 : i32
    return %c0_i32, %arg0, %c0_i32_0 : i32, i32, i32
  }
}

module attributes {stable_mosaic.version = 11 : i64} {
  func.func @_proj_mlp_kernel(%arg0: i32, %arg1: memref<32x32xbf16, #tpu.memory_space<vmem>>, %arg2: memref<32x32xbf16, #tpu.memory_space<vmem>>, %arg3: memref<32x32xbf16, #tpu.memory_space<vmem>>, %arg4: memref<1x32xf32, #tpu.memory_space<vmem>>, %arg5: memref<1x32xf32, #tpu.memory_space<vmem>>, %arg6: memref<1x32xf32, #tpu.memory_space<vmem>>, %arg7: memref<32x128xbf16, #tpu.memory_space<vmem>>, %arg8: memref<1x128xf32, #tpu.memory_space<vmem>>, %arg9: memref<128x32xbf16, #tpu.memory_space<vmem>>, %arg10: memref<1x32xf32, #tpu.memory_space<vmem>>, %arg11: memref<32x32xbf16, #tpu.memory_space<vmem>>) attributes {dimension_semantics = [#tpu.dimension_semantics<parallel>], iteration_bounds = array<i64: 1>, scalar_prefetch = 0 : i64, scratch_operands = 0 : i64, tpu.core_type = #tpu.core_type<tc>, window_params = [{transform_indices = @transform_0, window_bounds = array<i64: 32, 32>}, {transform_indices = @transform_1, window_bounds = array<i64: 32, 32>}, {pipeline_mode = #tpu.pipeline_mode<synchronous>, transform_indices = @transform_2, window_bounds = array<i64: 32, 32>}, {pipeline_mode = #tpu.pipeline_mode<synchronous>, transform_indices = @transform_3, window_bounds = array<i64: 1, 32>}, {pipeline_mode = #tpu.pipeline_mode<synchronous>, transform_indices = @transform_4, window_bounds = array<i64: 1, 32>}, {pipeline_mode = #tpu.pipeline_mode<synchronous>, transform_indices = @transform_5, window_bounds = array<i64: 1, 32>}, {pipeline_mode = #tpu.pipeline_mode<synchronous>, transform_indices = @transform_6, window_bounds = array<i64: 32, 128>}, {pipeline_mode = #tpu.pipeline_mode<synchronous>, transform_indices = @transform_7, window_bounds = array<i64: 1, 128>}, {pipeline_mode = #tpu.pipeline_mode<synchronous>, transform_indices = @transform_8, window_bounds = array<i64: 128, 32>}, {pipeline_mode = #tpu.pipeline_mode<synchronous>, transform_indices = @transform_9, window_bounds = array<i64: 1, 32>}, {transform_indices = @transform_10, window_bounds = array<i64: 32, 32>}]} {
    %c0 = arith.constant 0 : index
    %c0_0 = arith.constant 0 : index
    %0 = vector.load %arg1[%c0, %c0_0] : memref<32x32xbf16, #tpu.memory_space<vmem>>, vector<32x32xbf16>
    %c0_1 = arith.constant 0 : index
    %c0_2 = arith.constant 0 : index
    %1 = vector.load %arg3[%c0_1, %c0_2] : memref<32x32xbf16, #tpu.memory_space<vmem>>, vector<32x32xbf16>
    %cst = arith.constant dense<0.000000e+00> : vector<32x32xf32>
    %2 = tpu.matmul %0, %1, %cst {dimension_numbers = #tpu.dot_dimension_numbers<[1], [0], [0], [1], [0, 0, 1, 1], [], []>} : vector<32x32xbf16>, vector<32x32xbf16>, vector<32x32xf32> -> vector<32x32xf32>
    %c0_3 = arith.constant 0 : index
    %c0_4 = arith.constant 0 : index
    %3 = vector.load %arg4[%c0_3, %c0_4] : memref<1x32xf32, #tpu.memory_space<vmem>>, vector<1x32xf32>
    %4 = vector.broadcast %3 : vector<1x32xf32> to vector<32x32xf32>
    %5 = arith.addf %2, %4 : vector<32x32xf32>
    %c0_5 = arith.constant 0 : index
    %c0_6 = arith.constant 0 : index
    %6 = vector.load %arg2[%c0_5, %c0_6] : memref<32x32xbf16, #tpu.memory_space<vmem>>, vector<32x32xbf16>
    %7 = arith.extf %6 : vector<32x32xbf16> to vector<32x32xf32>
    %8 = arith.addf %5, %7 : vector<32x32xf32>
    %cst_7 = arith.constant dense<0.000000e+00> : vector<32xf32>
    %9 = vector.multi_reduction <add>, %8, %cst_7 [1] : vector<32x32xf32> to vector<32xf32>
    %10 = vector.shape_cast %9 : vector<32xf32> to vector<32x1xf32>
    %cst_8 = arith.constant 3.200000e+01 : f32
    %11 = vector.broadcast %cst_8 : f32 to vector<32x1xf32>
    %12 = arith.divf %10, %11 : vector<32x1xf32>
    %13 = vector.broadcast %12 : vector<32x1xf32> to vector<32x32xf32>
    %14 = arith.subf %8, %13 : vector<32x32xf32>
    %15 = arith.mulf %14, %14 : vector<32x32xf32>
    %cst_9 = arith.constant dense<0.000000e+00> : vector<32xf32>
    %16 = vector.multi_reduction <add>, %15, %cst_9 [1] : vector<32x32xf32> to vector<32xf32>
    %17 = vector.shape_cast %16 : vector<32xf32> to vector<32x1xf32>
    %cst_10 = arith.constant 3.200000e+01 : f32
    %18 = vector.broadcast %cst_10 : f32 to vector<32x1xf32>
    %19 = arith.divf %17, %18 : vector<32x1xf32>
    %cst_11 = arith.constant 9.99999974E-6 : f32
    %20 = vector.broadcast %cst_11 : f32 to vector<32x1xf32>
    %21 = arith.addf %19, %20 : vector<32x1xf32>
    %22 = math.rsqrt %21 : vector<32x1xf32>
    %23 = vector.broadcast %22 : vector<32x1xf32> to vector<32x32xf32>
    %24 = arith.mulf %14, %23 : vector<32x32xf32>
    %c0_12 = arith.constant 0 : index
    %c0_13 = arith.constant 0 : index
    %25 = vector.load %arg5[%c0_12, %c0_13] : memref<1x32xf32, #tpu.memory_space<vmem>>, vector<1x32xf32>
    %26 = vector.broadcast %25 : vector<1x32xf32> to vector<32x32xf32>
    %27 = arith.mulf %24, %26 : vector<32x32xf32>
    %c0_14 = arith.constant 0 : index
    %c0_15 = arith.constant 0 : index
    %28 = vector.load %arg6[%c0_14, %c0_15] : memref<1x32xf32, #tpu.memory_space<vmem>>, vector<1x32xf32>
    %29 = vector.broadcast %28 : vector<1x32xf32> to vector<32x32xf32>
    %30 = arith.addf %27, %29 : vector<32x32xf32>
    %31 = arith.truncf %30 : vector<32x32xf32> to vector<32x32xbf16>
    %c0_16 = arith.constant 0 : index
    %c0_17 = arith.constant 0 : index
    %32 = vector.load %arg7[%c0_16, %c0_17] : memref<32x128xbf16, #tpu.memory_space<vmem>>, vector<32x128xbf16>
    %cst_18 = arith.constant dense<0.000000e+00> : vector<32x128xf32>
    %33 = tpu.matmul %31, %32, %cst_18 {dimension_numbers = #tpu.dot_dimension_numbers<[1], [0], [0], [1], [0, 0, 1, 1], [], []>} : vector<32x32xbf16>, vector<32x128xbf16>, vector<32x128xf32> -> vector<32x128xf32>
    %c0_19 = arith.constant 0 : index
    %c0_20 = arith.constant 0 : index
    %34 = vector.load %arg8[%c0_19, %c0_20] : memref<1x128xf32, #tpu.memory_space<vmem>>, vector<1x128xf32>
    %35 = vector.broadcast %34 : vector<1x128xf32> to vector<32x128xf32>
    %36 = arith.addf %33, %35 : vector<32x128xf32>
    %cst_21 = arith.constant 1.702000e+00 : f32
    %37 = vector.broadcast %cst_21 : f32 to vector<32x128xf32>
    %38 = arith.mulf %37, %36 : vector<32x128xf32>
    %39 = arith.negf %38 : vector<32x128xf32>
    %40 = math.exp %39 : vector<32x128xf32>
    %cst_22 = arith.constant 1.000000e+00 : f32
    %41 = vector.broadcast %cst_22 : f32 to vector<32x128xf32>
    %42 = arith.addf %41, %40 : vector<32x128xf32>
    %43 = arith.divf %41, %42 : vector<32x128xf32>
    %44 = arith.mulf %36, %43 : vector<32x128xf32>
    %45 = arith.truncf %44 : vector<32x128xf32> to vector<32x128xbf16>
    %c0_23 = arith.constant 0 : index
    %c0_24 = arith.constant 0 : index
    %46 = vector.load %arg9[%c0_23, %c0_24] : memref<128x32xbf16, #tpu.memory_space<vmem>>, vector<128x32xbf16>
    %cst_25 = arith.constant dense<0.000000e+00> : vector<32x32xf32>
    %47 = tpu.matmul %45, %46, %cst_25 {dimension_numbers = #tpu.dot_dimension_numbers<[1], [0], [0], [1], [0, 0, 1, 1], [], []>} : vector<32x128xbf16>, vector<128x32xbf16>, vector<32x32xf32> -> vector<32x32xf32>
    %c0_26 = arith.constant 0 : index
    %c0_27 = arith.constant 0 : index
    %48 = vector.load %arg10[%c0_26, %c0_27] : memref<1x32xf32, #tpu.memory_space<vmem>>, vector<1x32xf32>
    %49 = vector.broadcast %48 : vector<1x32xf32> to vector<32x32xf32>
    %50 = arith.addf %47, %49 : vector<32x32xf32>
    %51 = arith.addf %50, %8 : vector<32x32xf32>
    %52 = arith.truncf %51 : vector<32x32xf32> to vector<32x32xbf16>
    %c0_28 = arith.constant 0 : index
    %c0_29 = arith.constant 0 : index
    %53 = vector.load %arg11[%c0_28, %c0_29] : memref<32x32xbf16, #tpu.memory_space<vmem>>, vector<32x32xbf16>
    tpu.vector_store %arg11[%c0_28, %c0_29], %52 {strides = array<i32>} : memref<32x32xbf16, #tpu.memory_space<vmem>>, vector<32x32xbf16>,
    return
  }
  func.func @transform_0(%arg0: i32) -> (i32, i32) {
    %c0_i32 = arith.constant 0 : i32
    %c0_i32_0 = arith.constant 0 : i32
    return %arg0, %c0_i32 : i32, i32
  }
  func.func @transform_1(%arg0: i32) -> (i32, i32) {
    %c0_i32 = arith.constant 0 : i32
    %c0_i32_0 = arith.constant 0 : i32
    return %arg0, %c0_i32 : i32, i32
  }
  func.func @transform_2(%arg0: i32) -> (i32, i32) {
    %c0_i32 = arith.constant 0 : i32
    %c0_i32_0 = arith.constant 0 : i32
    %c0_i32_1 = arith.constant 0 : i32
    return %c0_i32, %c0_i32_0 : i32, i32
  }
  func.func @transform_3(%arg0: i32) -> (i32, i32) {
    %c0_i32 = arith.constant 0 : i32
    %c0_i32_0 = arith.constant 0 : i32
    %c0_i32_1 = arith.constant 0 : i32
    return %c0_i32, %c0_i32_0 : i32, i32
  }
  func.func @transform_4(%arg0: i32) -> (i32, i32) {
    %c0_i32 = arith.constant 0 : i32
    %c0_i32_0 = arith.constant 0 : i32
    %c0_i32_1 = arith.constant 0 : i32
    return %c0_i32, %c0_i32_0 : i32, i32
  }
  func.func @transform_5(%arg0: i32) -> (i32, i32) {
    %c0_i32 = arith.constant 0 : i32
    %c0_i32_0 = arith.constant 0 : i32
    %c0_i32_1 = arith.constant 0 : i32
    return %c0_i32, %c0_i32_0 : i32, i32
  }
  func.func @transform_6(%arg0: i32) -> (i32, i32) {
    %c0_i32 = arith.constant 0 : i32
    %c0_i32_0 = arith.constant 0 : i32
    %c0_i32_1 = arith.constant 0 : i32
    return %c0_i32, %c0_i32_0 : i32, i32
  }
  func.func @transform_7(%arg0: i32) -> (i32, i32) {
    %c0_i32 = arith.constant 0 : i32
    %c0_i32_0 = arith.constant 0 : i32
    %c0_i32_1 = arith.constant 0 : i32
    return %c0_i32, %c0_i32_0 : i32, i32
  }
  func.func @transform_8(%arg0: i32) -> (i32, i32) {
    %c0_i32 = arith.constant 0 : i32
    %c0_i32_0 = arith.constant 0 : i32
    %c0_i32_1 = arith.constant 0 : i32
    return %c0_i32, %c0_i32_0 : i32, i32
  }
  func.func @transform_9(%arg0: i32) -> (i32, i32) {
    %c0_i32 = arith.constant 0 : i32
    %c0_i32_0 = arith.constant 0 : i32
    %c0_i32_1 = arith.constant 0 : i32
    return %c0_i32, %c0_i32_0 : i32, i32
  }
  func.func @transform_10(%arg0: i32) -> (i32, i32) {
    %c0_i32 = arith.constant 0 : i32
    %c0_i32_0 = arith.constant 0 : i32
    return %arg0, %c0_i32 : i32, i32
  }
}

module attributes {stable_mosaic.version = 11 : i64} {
  func.func @_ln_matmul_kernel(%arg0: i32, %arg1: memref<6x32xbf16, #tpu.memory_space<vmem>>, %arg2: memref<1x32xf32, #tpu.memory_space<vmem>>, %arg3: memref<1x32xf32, #tpu.memory_space<vmem>>, %arg4: memref<32x128xbf16, #tpu.memory_space<vmem>>, %arg5: memref<1x128xf32, #tpu.memory_space<vmem>>, %arg6: memref<6x128xf32, #tpu.memory_space<vmem>>) attributes {dimension_semantics = [#tpu.dimension_semantics<parallel>], iteration_bounds = array<i64: 1>, scalar_prefetch = 0 : i64, scratch_operands = 0 : i64, tpu.core_type = #tpu.core_type<tc>, window_params = [{transform_indices = @transform_0, window_bounds = array<i64: 6, 32>}, {pipeline_mode = #tpu.pipeline_mode<synchronous>, transform_indices = @transform_1, window_bounds = array<i64: 1, 32>}, {pipeline_mode = #tpu.pipeline_mode<synchronous>, transform_indices = @transform_2, window_bounds = array<i64: 1, 32>}, {pipeline_mode = #tpu.pipeline_mode<synchronous>, transform_indices = @transform_3, window_bounds = array<i64: 32, 128>}, {pipeline_mode = #tpu.pipeline_mode<synchronous>, transform_indices = @transform_4, window_bounds = array<i64: 1, 128>}, {transform_indices = @transform_5, window_bounds = array<i64: 6, 128>}]} {
    %c0 = arith.constant 0 : index
    %c0_0 = arith.constant 0 : index
    %0 = vector.load %arg1[%c0, %c0_0] : memref<6x32xbf16, #tpu.memory_space<vmem>>, vector<6x32xbf16>
    %1 = arith.extf %0 : vector<6x32xbf16> to vector<6x32xf32>
    %cst = arith.constant dense<0.000000e+00> : vector<6xf32>
    %2 = vector.multi_reduction <add>, %1, %cst [1] : vector<6x32xf32> to vector<6xf32>
    %3 = vector.shape_cast %2 : vector<6xf32> to vector<6x1xf32>
    %cst_1 = arith.constant 3.200000e+01 : f32
    %4 = vector.broadcast %cst_1 : f32 to vector<6x1xf32>
    %5 = arith.divf %3, %4 : vector<6x1xf32>
    %6 = vector.broadcast %5 : vector<6x1xf32> to vector<6x32xf32>
    %7 = arith.subf %1, %6 : vector<6x32xf32>
    %8 = arith.mulf %7, %7 : vector<6x32xf32>
    %cst_2 = arith.constant dense<0.000000e+00> : vector<6xf32>
    %9 = vector.multi_reduction <add>, %8, %cst_2 [1] : vector<6x32xf32> to vector<6xf32>
    %10 = vector.shape_cast %9 : vector<6xf32> to vector<6x1xf32>
    %cst_3 = arith.constant 3.200000e+01 : f32
    %11 = vector.broadcast %cst_3 : f32 to vector<6x1xf32>
    %12 = arith.divf %10, %11 : vector<6x1xf32>
    %cst_4 = arith.constant 9.99999974E-6 : f32
    %13 = vector.broadcast %cst_4 : f32 to vector<6x1xf32>
    %14 = arith.addf %12, %13 : vector<6x1xf32>
    %15 = math.rsqrt %14 : vector<6x1xf32>
    %16 = vector.broadcast %15 : vector<6x1xf32> to vector<6x32xf32>
    %17 = arith.mulf %7, %16 : vector<6x32xf32>
    %c0_5 = arith.constant 0 : index
    %c0_6 = arith.constant 0 : index
    %18 = vector.load %arg2[%c0_5, %c0_6] : memref<1x32xf32, #tpu.memory_space<vmem>>, vector<1x32xf32>
    %19 = vector.broadcast %18 : vector<1x32xf32> to vector<6x32xf32>
    %20 = arith.mulf %17, %19 : vector<6x32xf32>
    %c0_7 = arith.constant 0 : index
    %c0_8 = arith.constant 0 : index
    %21 = vector.load %arg3[%c0_7, %c0_8] : memref<1x32xf32, #tpu.memory_space<vmem>>, vector<1x32xf32>
    %22 = vector.broadcast %21 : vector<1x32xf32> to vector<6x32xf32>
    %23 = arith.addf %20, %22 : vector<6x32xf32>
    %24 = arith.truncf %23 : vector<6x32xf32> to vector<6x32xbf16>
    %c0_9 = arith.constant 0 : index
    %c0_10 = arith.constant 0 : index
    %25 = vector.load %arg4[%c0_9, %c0_10] : memref<32x128xbf16, #tpu.memory_space<vmem>>, vector<32x128xbf16>
    %cst_11 = arith.constant dense<0.000000e+00> : vector<6x128xf32>
    %26 = tpu.matmul %24, %25, %cst_11 {dimension_numbers = #tpu.dot_dimension_numbers<[1], [0], [0], [1], [0, 0, 1, 1], [], []>} : vector<6x32xbf16>, vector<32x128xbf16>, vector<6x128xf32> -> vector<6x128xf32>
    %c0_12 = arith.constant 0 : index
    %c0_13 = arith.constant 0 : index
    %27 = vector.load %arg5[%c0_12, %c0_13] : memref<1x128xf32, #tpu.memory_space<vmem>>, vector<1x128xf32>
    %28 = vector.broadcast %27 : vector<1x128xf32> to vector<6x128xf32>
    %29 = arith.addf %26, %28 : vector<6x128xf32>
    %c0_14 = arith.constant 0 : index
    %c0_15 = arith.constant 0 : index
    %30 = vector.load %arg6[%c0_14, %c0_15] : memref<6x128xf32, #tpu.memory_space<vmem>>, vector<6x128xf32>
    tpu.vector_store %arg6[%c0_14, %c0_15], %29 {strides = array<i32>} : memref<6x128xf32, #tpu.memory_space<vmem>>, vector<6x128xf32>,
    return
  }
  func.func @transform_0(%arg0: i32) -> (i32, i32) {
    %c0_i32 = arith.constant 0 : i32
    %c0_i32_0 = arith.constant 0 : i32
    return %arg0, %c0_i32 : i32, i32
  }
  func.func @transform_1(%arg0: i32) -> (i32, i32) {
    %c0_i32 = arith.constant 0 : i32
    %c0_i32_0 = arith.constant 0 : i32
    %c0_i32_1 = arith.constant 0 : i32
    return %c0_i32, %c0_i32_0 : i32, i32
  }
  func.func @transform_2(%arg0: i32) -> (i32, i32) {
    %c0_i32 = arith.constant 0 : i32
    %c0_i32_0 = arith.constant 0 : i32
    %c0_i32_1 = arith.constant 0 : i32
    return %c0_i32, %c0_i32_0 : i32, i32
  }
  func.func @transform_3(%arg0: i32) -> (i32, i32) {
    %c0_i32 = arith.constant 0 : i32
    %c0_i32_0 = arith.constant 0 : i32
    %c0_i32_1 = arith.constant 0 : i32
    return %c0_i32, %c0_i32_0 : i32, i32
  }
  func.func @transform_4(%arg0: i32) -> (i32, i32) {
    %c0_i32 = arith.constant 0 : i32
    %c0_i32_0 = arith.constant 0 : i32
    %c0_i32_1 = arith.constant 0 : i32
    return %c0_i32, %c0_i32_0 : i32, i32
  }
  func.func @transform_5(%arg0: i32) -> (i32, i32) {
    %c0_i32 = arith.constant 0 : i32
    %c0_i32_0 = arith.constant 0 : i32
    return %arg0, %c0_i32 : i32, i32
  }
}

</mosaic_0001>

<bundles_post_ra>
// kernel: _lambda_.9
= control target key start
LH: loop header
LB: loop body
LE: loop exit
PB: predicated region body
PF: predicated region fallthrough
CT: control target
= control target key end

     0   :  { %vm211_vm0 = vcmask 257024   ;;  %s365_s1 = inlined_call_operand.vmem [shape: bf16[256,32], index: 1, kind: input, shape index: {}]   ;;  %s366_s0 = inlined_call_operand.vmem [shape: bf16[16,256], index: 0, kind: input, shape index: {}]   ;;  %s367_s2 = inlined_call_operand.vmem [shape: f32[1,32], index: 2, kind: input, shape index: {}]   ;;  %s368_s3 = inlined_call_operand.vmem [shape: bf16[16,32], index: 3, kind: output, shape index: {}]  }
   0x1   :  { %v263_v0 = vld [vmem:[%s365_s1 + $0x40] sm:$0xff]   ;;  %v265_v2 = vld [vmem:[%s365_s1 + $0x48] sm:$0xff]   ;;  %v267_v4 = vld [vmem:[%s365_s1 + $0x50] sm:$0xff]  }
   0x2   :  { %v264_v1 = vld [vmem:[%s365_s1] sm:$0xff]   ;;  %241 = vmatprep.subr.bf16.mxu0 %v263_v0  ;;  %v266_v3 = vld [vmem:[%s365_s1 + $0x8] sm:$0xff]   ;;  %v268_v5 = vld [vmem:[%s365_s1 + $0x10] sm:$0xff]  }
   0x3   :  { %242 = vmatpush3.bf16.msra.mxu0 %v264_v1  ;;  %v269_v6 = vld [vmem:[%s365_s1 + $0x58] sm:$0xff]   ;;  %v271_v8 = vld [vmem:[%s365_s1 + $0x60] sm:$0xff]   ;;  %v273_v10 = vld [vmem:[%s365_s1 + $0x68] sm:$0xff]  }
   0x4   :  { %243 = vmatprep.subr.bf16.mxu0 %v265_v2  ;;  %v270_v7 = vld [vmem:[%s365_s1 + $0x18] sm:$0xff]   ;;  %v272_v9 = vld [vmem:[%s365_s1 + $0x20] sm:$0xff]   ;;  %v274_v12 = vld [vmem:[%s365_s1 + $0x28] sm:$0xff]  }
   0x5   :  { %v281_v11 = vld [vmem:[%s366_s0 + $0x4] ss:$8 sps:$4 sm:$0xff]   ;;  %v275_v13 = vld [vmem:[%s365_s1 + $0x70] sm:$0xff]   ;;  %v277_v15 = vld [vmem:[%s365_s1 + $0x78] sm:$0xff]  }
   0x6   :  { %194 = vmatprep.mubr.bf16.mxu0 %v281_v11  ;;  %v276_v14 = vld [vmem:[%s365_s1 + $0x30] sm:$0xff]   ;;  %v278_v16 = vld [vmem:[%s365_s1 + $0x38] sm:$0xff]   ;;  %v279_v17 = vld [vmem:[%s366_s0] ss:$8 sps:$4 sm:$0xff]  }
   0x7   :  { %244 = vmatpush3.bf16.msra.mxu0 %v266_v3  ;;  %v218_v19 = vld [vmem:[%s367_s2] ss:$0 sm:$0xff] }
   0x8   :  { %245 = vmatprep.subr.bf16.mxu0 %v267_v4 }
   0xb   :  { %246 = vmatpush3.bf16.msra.mxu0 %v268_v5 }
   0xc   :  { %247 = vmatprep.subr.bf16.mxu0 %v269_v6 }
   0xf   :  { %248 = vmatpush3.bf16.msra.mxu0 %v270_v7 }
  0x10   :  { %249 = vmatprep.subr.bf16.mxu0 %v271_v8 }
  0x13   :  { %250 = vmatpush3.bf16.msra.mxu0 %v272_v9 }
  0x14   :  { %251 = vmatprep.subr.bf16.mxu0 %v273_v10 }
  0x17   :  { %252 = vmatpush3.bf16.msra.mxu0 %v274_v12 }
  0x18   :  { %253 = vmatprep.subr.bf16.mxu0 %v275_v13 }
  0x1b   :  { %254 = vmatpush3.bf16.msra.mxu0 %v276_v14 }
  0x1c   :  { %255 = vmatprep.subr.bf16.mxu0 %v277_v15 }
  0x1f   :  { %256 = vmatpush3.bf16.msra.mxu0 %v278_v16 }
  0x22   :  { %195 = vmatmul.mubr.bf16.vlgmr.msra.gmra.mrb[0].mxu0 %v279_v17 }
  0xf5   :  { %v257_v18 = vpop.f32.mrb[0].mxu0 }
  0xf6   :  { %v258_v20 = vpop.f32.mrb[1].mxu0 }
  0xf7   :  { %v259_v21 = vadd.f32 %v258_v20, %v257_v18  ;;  %v260_v22 = vpop.f32.mrb[2].mxu0 }
  0xf8   :  { %v261_v23 = vpop.f32.mrb[3].mxu0 }
  0xf9   :  { %v197_v24 = vadd.f32 %v259_v21, %v218_v19  ;;  %v262_v25 = vadd.f32 %v261_v23, %v260_v22 }
  0xfb   :  { %v239_v26 = vpack.c.bf16 %v197_v24, %v197_v24  ;;  %v200_v27 = vadd.f32 %v262_v25, %v218_v19 }
  0xfd   :  { %212 = vst.msk [vmem:[%s368_s3] sm:$0xf] %vm211_vm0, %v239_v26  ;;  %v240_v28 = vpack.c.bf16 %v200_v27, %v200_v27 }
  0xff   :  { %213 = vst.msk [vmem:[%s368_s3 + $0x4] sm:$0xf] %vm211_vm0, %v240_v28 }

// kernel: _lambda_.10
= control target key start
LH: loop header
LB: loop body
LE: loop exit
PB: predicated region body
PF: predicated region fallthrough
CT: control target
= control target key end

     0   :  { %vm26_vm0 = vcmask 253952   ;;  %vm72_vm1 = vcmask 257024   ;;  %v126_v54 = vlaneseq  ;;  %vm45_vm2 = vsmask.f32 256  ;;  %s385_s1 = inlined_call_operand.vmem [shape: bf16[1,32], index: 1, kind: input, shape index: {}]   ;;  %s386_s2 = inlined_call_operand.vmem [shape: f32[5,32], index: 2, kind: input, shape index: {}]   ;;  %s387_s0 = inlined_call_operand.vmem [shape: bf16[4,4,32], index: 0, kind: input, shape index: {}]   ;;  %s388_s3 = inlined_call_operand.vmem [shape: f32[1,32], index: 3, kind: input, shape index: {}]   ;;  %s389_s4 = inlined_call_operand.vmem [shape: f32[1,32], index: 4, kind: input, shape index: {}]   ;;  %s390_s5 = inlined_call_operand.vmem [shape: bf16[4,5,32], index: 5, kind: output, shape index: {}]  }
   0x1   :  { %v22_v0 = vld [vmem:[%s385_s1] sm:$0x1]  ;;  %v67_v3 = vld [vmem:[%s386_s2 + $0x1] sm:$0xf]  ;;  %v62_v9 = vld [vmem:[%s387_s0 + $0x6] sm:$0x3] }
   0x2   :  { %v24_v1 = vld [vmem:[%s386_s2] sm:$0x1]  ;;  %v23_v2 = vunpack.c.l.bf16 %v22_v0  ;;  %v60_v4 = vld [vmem:[%s387_s0 + $0x2] sm:$0x3]  ;;  %v61_v8 = vld [vmem:[%s387_s0 + $0x4] sm:$0x3]  ;;  %v66_v12 = vunpack.c.l.bf16 %v62_v9 }
   0x3   :  { %v59_v5 = vld [vmem:[%s387_s0] sm:$0x3]  ;;  %v64_v6 = vunpack.c.l.bf16 %v60_v4  ;;  %v65_v11 = vunpack.c.l.bf16 %v61_v8  ;;  %v127_v61 = vshrl.u32 %v126_v54, 7  ;;  %vm310_vm3 = vmand %vm26_vm0, %vm45_vm2  ;;  %vm193_vm4 = vcmask 256000  }
   0x4   :  { %v63_v7 = vunpack.c.l.bf16 %v59_v5  ;;  %v25_v10 = vadd.f32 %v24_v1, %v23_v2  ;;  %v71_v19 = vadd.f32 %v67_v3, %v66_v12  ;;  %v20_v2 = vld [vmem:[%s388_s3] sm:$0x1]  ;;  %vm194_vm5 = vsmask.f32 2306 }
   0x5   :  { %v69_v13 = vadd.f32 %v67_v3, %v64_v6  ;;  %v70_v16 = vadd.f32 %v67_v3, %v65_v11  ;;  %v128_v0 = vsub.s32 0, %v127_v61  ;;  %v21_v4 = vld [vmem:[%s389_s4] sm:$0x1]  ;;  %vm349_vm6 = vmand %vm193_vm4, %vm194_vm5 }
   0x6   :  { %v68_v14 = vadd.f32 %v67_v3, %v63_v7  ;;  %v27_v15 = vsel %vm26_vm0, %v25_v10, 0.0  ;;  %v82_v21 = vsel %vm72_vm1, %v71_v19, 0.0 }
   0x7   :  { %28 = vadd.xlane.f32.xlu0 %v27_v15  ;;  %v76_v17 = vsel %vm72_vm1, %v69_v13, 0.0  ;;  %v79_v20 = vsel %vm72_vm1, %v70_v16, 0.0  ;;  %v129_v5 = vrot.slane %v20_v2, %v128_v0  ;;  %v56_v15 = vld [vmem:[%s390_s5 + $0xc] sm:$0x1] }
   0x8   :  { %77 = vadd.xlane.f32.xlu1 %v76_v17  ;;  %v73_v18 = vsel %vm72_vm1, %v68_v14, 0.0 }
   0xb   :  { %74 = vadd.xlane.f32.xlu0 %v73_v18 }
   0xc   :  { %80 = vadd.xlane.f32.xlu1 %v79_v20 }
   0xf   :  { %83 = vadd.xlane.f32.xlu0 %v82_v21 }
  0x94   :  { %v29_v22 = vpop.xlane.xlu0 %28 }
  0x95   :  { %v31_v23 = vmul.f32 0.03125, %v29_v22  ;;  %v78_v24 = vpop.xlane.xlu1 %77 }
  0x96   :  { %v86_v25 = vmul.f32 0.03125, %v78_v24 }
  0x97   :  { %v32_v26 = vsub.f32 %v25_v10, %v31_v23  ;;  %v47_v10 = vld [vmem:[%s390_s5] sm:$0x1] }
  0x98   :  { %v286_v27 = vsub.f32 %v69_v13, %v86_v25  ;;  %v75_v28 = vpop.xlane.xlu0 %74  ;;  %v50_v13 = vld [vmem:[%s390_s5 + $0x4] sm:$0x1] }
  0x99   :  { %v85_v29 = vmul.f32 0.03125, %v75_v28  ;;  %v33_v30 = vmul.f32 %v32_v26, %v32_v26  ;;  %v81_v31 = vpop.xlane.xlu1 %80 }
  0x9a   :  { %v87_v32 = vmul.f32 0.03125, %v81_v31  ;;  %v94_v33 = vmul.f32 %v286_v27, %v286_v27 }
  0x9b   :  { %v89_v34 = vsub.f32 %v68_v14, %v85_v29  ;;  %v34_v35 = vsel %vm26_vm0, %v33_v30, 0.0  ;;  %v53_v14 = vld [vmem:[%s390_s5 + $0x8] sm:$0x1] }
  0x9c   :  { %35 = vadd.xlane.f32.xlu1 %v34_v35  ;;  %v291_v36 = vsub.f32 %v70_v16, %v87_v32  ;;  %v84_v37 = vpop.xlane.xlu0 %83  ;;  %v100_v39 = vsel %vm72_vm1, %v94_v33, 0.0  ;;  %v139_v16 = vrot.slane %v21_v4, %v128_v0 }
  0x9d   :  { %v88_v38 = vmul.f32 0.03125, %v84_v37  ;;  %v93_v40 = vmul.f32 %v89_v34, %v89_v34 }
  0x9e   :  { %v95_v41 = vmul.f32 %v291_v36, %v291_v36 }
  0x9f   :  { %v296_v42 = vsub.f32 %v71_v19, %v88_v38  ;;  %v97_v43 = vsel %vm72_vm1, %v93_v40, 0.0 }
  0xa0   :  { %101 = vadd.xlane.f32.xlu1 %v100_v39  ;;  %98 = vadd.xlane.f32.xlu0 %v97_v43  ;;  %v103_v44 = vsel %vm72_vm1, %v95_v41, 0.0 }
  0xa1   :  { %v96_v45 = vmul.f32 %v296_v42, %v296_v42 }
  0xa3   :  { %v106_v46 = vsel %vm72_vm1, %v96_v45, 0.0 }
  0xa4   :  { %104 = vadd.xlane.f32.xlu0 %v103_v44  ;;  %107 = vadd.xlane.f32.xlu1 %v106_v46 }
 0x129   :  { %v36_v47 = vpop.xlane.xlu1 %35 }
 0x12a   :  { %v37_v48 = vmul.f32 0.03125, %v36_v47 }
 0x12c   :  { %v38_v49 = vadd.f32 1e-05, %v37_v48 }
 0x12d   :  { %v102_v50 = vpop.xlane.xlu1 %101  ;;  %v99_v51 = vpop.xlane.xlu0 %98 }
 0x12e   :  { %220 = vrsqrt.f32 %v38_v49  ;;  %v110_v52 = vmul.f32 0.03125, %v102_v50  ;;  %v109_v53 = vmul.f32 0.03125, %v99_v51 }
 0x130   :  { %v114_v55 = vadd.f32 1e-05, %v110_v52  ;;  %v113_v56 = vadd.f32 1e-05, %v109_v53 }
 0x131   :  { %v108_v57 = vpop.xlane.xlu1 %107  ;;  %v105_v58 = vpop.xlane.xlu0 %104 }
 0x132   :  { %222 = vrsqrt.f32 %v114_v55  ;;  %v112_v59 = vmul.f32 0.03125, %v108_v57  ;;  %v111_v60 = vmul.f32 0.03125, %v105_v58 }
 0x133   :  { %224 = vrsqrt.f32 %v113_v56 }
 0x134   :  { %v116_v62 = vadd.f32 1e-05, %v112_v59  ;;  %v115_v63 = vadd.f32 1e-05, %v111_v60 }
 0x136   :  { %226 = vrsqrt.f32 %v116_v62 }
 0x137   :  { %228 = vrsqrt.f32 %v115_v63 }
 0x138   :  { %v221_v1 = vpop.eup %220 }
 0x139   :  { %v40_v3 = vmul.f32 %v221_v1, %v32_v26 }
 0x13b   :  { %v41_v6 = vmul.f32 %v40_v3, %v20_v2 }
 0x13c   :  { %v223_v7 = vpop.eup %222 }
 0x13d   :  { %v225_v8 = vpop.eup %224  ;;  %v42_v11 = vadd.f32 %v41_v6, %v21_v4  ;;  %v122_v12 = vmul.f32 %v223_v7, %v286_v27 }
 0x13e   :  { %v121_v17 = vmul.f32 %v225_v8, %v89_v34 }
 0x13f   :  { %v43_v18 = vpack.c.bf16 %v42_v11, %v42_v11  ;;  %v132_v19 = vmul.f32 %v129_v5, %v122_v12 }
 0x140   :  { %v227_v20 = vpop.eup %226  ;;  %v131_v21 = vmul.f32 %v129_v5, %v121_v17 }
 0x141   :  { %v229_v22 = vpop.eup %228  ;;  %v48_v23 = vsel %vm310_vm3, %v43_v18, %v47_v10  ;;  %v51_v24 = vsel %vm310_vm3, %v43_v18, %v50_v13  ;;  %v54_v25 = vsel %vm310_vm3, %v43_v18, %v53_v14  ;;  %v57_v26 = vsel %vm310_vm3, %v43_v18, %v56_v15 }
 0x142   :  { %49 = vst [vmem:[%s390_s5] sm:$0x1] %v48_v23  ;;  %52 = vst [vmem:[%s390_s5 + $0x4] sm:$0x1] %v51_v24  ;;  %v142_v27 = vadd.f32 %v139_v16, %v132_v19  ;;  %v141_v28 = vadd.f32 %v139_v16, %v131_v21  ;;  %v124_v29 = vmul.f32 %v227_v20, %v296_v42 }
 0x143   :  { %55 = vst [vmem:[%s390_s5 + $0x8] sm:$0x1] %v54_v25  ;;  %58 = vst [vmem:[%s390_s5 + $0xc] sm:$0x1] %v57_v26  ;;  %v123_v30 = vmul.f32 %v229_v22, %v291_v36 }
 0x144   :  { %v217_v31 = vpack.c.bf16 %v142_v27, %v142_v27  ;;  %v216_v32 = vpack.c.bf16 %v141_v28, %v141_v28  ;;  %v134_v33 = vmul.f32 %v129_v5, %v124_v29 }
 0x145   :  { %v133_v34 = vmul.f32 %v129_v5, %v123_v30 }
 0x146   :  { %v169_v35 = vshrl.u32 %v217_v31, 16  ;;  %v162_v37 = vshrl.u32 %v216_v32, 16  ;;  %v144_v38 = vadd.f32 %v139_v16, %v134_v33  ;;  %v172_v41 = vshll.u32 %v217_v31, 16 }
 0x147   :  { %v143_v39 = vadd.f32 %v139_v16, %v133_v34  ;;  %v165_v44 = vshll.u32 %v216_v32, 16 }
 0x148   :  { %v171_v40 = vrot.slane %v169_v35, 7  ;;  %v164_v43 = vrot.slane %v162_v37, 7  ;;  %v219_v46 = vpack.c.bf16 %v144_v38, %v144_v38 }
 0x149   :  { %v199_v36 = vld [vmem:[%s390_s5 + $0x4] sm:$0x7]  ;;  %v196_v42 = vld [vmem:[%s390_s5] sm:$0x7]  ;;  %v218_v47 = vpack.c.bf16 %v143_v39, %v143_v39 }
 0x14a   :  { %v174_v48 = vor.u32 %v172_v41, %v171_v40  ;;  %v167_v49 = vor.u32 %v165_v44, %v164_v43  ;;  %v183_v50 = vshrl.u32 %v219_v46, 16  ;;  %v186_v55 = vshll.u32 %v219_v46, 16  ;;  %v205_v60 = vld [vmem:[%s390_s5 + $0xc] sm:$0x7]  ;;  %v202_v61 = vld [vmem:[%s390_s5 + $0x8] sm:$0x7] }
 0x14b   :  { %v176_v51 = vshrl.u32 %v218_v47, 16  ;;  %v179_v57 = vshll.u32 %v218_v47, 16 }
 0x14c   :  { %v200_v52 = vsel %vm349_vm6, %v174_v48, %v199_v36  ;;  %v197_v53 = vsel %vm349_vm6, %v167_v49, %v196_v42  ;;  %v185_v54 = vrot.slane %v183_v50, 7 }
 0x14d   :  { %201 = vst [vmem:[%s390_s5 + $0x4] sm:$0x7] %v200_v52  ;;  %198 = vst [vmem:[%s390_s5] sm:$0x7] %v197_v53  ;;  %v178_v56 = vrot.slane %v176_v51, 7 }
 0x14e   :  { %v188_v58 = vor.u32 %v186_v55, %v185_v54 }
 0x14f   :  { %v181_v59 = vor.u32 %v179_v57, %v178_v56 }
 0x150   :  { %v206_v62 = vsel %vm349_vm6, %v188_v58, %v205_v60 }
 0x151   :  { %v203_v63 = vsel %vm349_vm6, %v181_v59, %v202_v61  ;;  %207 = vst [vmem:[%s390_s5 + $0xc] sm:$0x7] %v206_v62 }
 0x152   :  { %204 = vst [vmem:[%s390_s5 + $0x8] sm:$0x7] %v203_v63 }

// kernel: _lambda_.12
= control target key start
LH: loop header
LB: loop body
LE: loop exit
PB: predicated region body
PF: predicated region fallthrough
CT: control target
= control target key end

     0   :  { %s1518_s12 = smov 0   ;;  %s1520_s13 = smov 0   ;;  %s1700_s0 = inlined_call_operand.vmem [shape: bf16[12,32,8], index: 0, kind: input, shape index: {}, may-alias: {0,1,2}]   ;;  %s1701_s1 = inlined_call_operand.vmem [shape: bf16[12,32,8], index: 1, kind: input, shape index: {}, may-alias: {0,1,2}]   ;;  %s1702_s2 = inlined_call_operand.vmem [shape: bf16[12,32,8], index: 2, kind: input, shape index: {}, may-alias: {0,1,2}]   ;;  %s1703_s3 = inlined_call_operand.vmem [shape: bf16[2,16,32], index: 3, kind: output, shape index: {}]  }
   0x1   :  { %s1522_s14 = smov 0   ;;  %s1524_s15 = smov 0  }
   0x2   :  { %s1526_s16 = smov 0  }
   0x3 LB: > { %s25_s17 = sadd.s32 1, %s1487_s15  ;;  %p41_p1 = scmp.ne.s32.totalorder %s1479_s13, %s1475_s12  ;;  %s1491_s16 = sphi %s1526_s16, %s13_s16   ;;  %s1487_s15 = sphi %s1524_s15, %s1708_s15   ;;  %s1483_s14 = sphi %s1522_s14, %s1707_s14   ;;  %s1479_s13 = sphi %s1520_s13, %s1706_s13   ;;  %s1475_s12 = sphi %s1518_s12, %s1705_s12  }
   0x4   : > { %p27_p0 = scmp.ge.s32.totalorder %s25_s17, 2  ;;  %p42_p2 = scmp.eq.s32.totalorder %s1491_s16, 0 }
   0x5   : > { %s34_s20 = sadd.s32 1, %s1479_s13  ;;  %p1205_p5 = scmp.ge.s32.totalorder %s1491_s16, 2 }
   0x6   : > { %s1710_s17 = smov (%p27_p0, %s25_s17), 0  ;;  %p1549_p3 = por %p42_p2, %p41_p1 }
   0x7   : > { %s30_s19 = ssub.s32 %s1487_s15, %s1710_s17  ;;  %155 = sbr.rel (%p1205_p5) target bundleno = 35 (0x23), region = 16 }
   0x8   : > { %p32_p4 = scmp.eq.s32.totalorder %s30_s19, 0 }
   0xa   : > { %s1557_s21 = scalar_select %p32_p4, %s1479_s13, %s34_s20  }
   0xe   : > { %158 = sbr.rel (!%p1549_p3) target bundleno = 21 (0x15), region = 20  ;;  %s160_s22 = sand.u32 (%p1549_p3), 1, %s1479_s13  }
   0xf   : > { %s1279_s23 = sshll.u32 (%p1549_p3), %s1487_s15, 3  ;;  %s1206_s24 = sshll.u32 (%p1549_p3), %s160_s22, 5 }
  0x10   : > { %s168_s27 = scalar_lea.vmem (%p1549_p3), %s1700_s0, %s1279_s23  ;;  %s162_s28 = scalar_lea.vmem (%p1549_p3), [#allocation2], %s1206_s24 }
  0x11   : > { %v184_v0 = vld [vmem:[%s168_s27] sm:$0xff] (%p1549_p3)   ;;  %v188_v1 = vld [vmem:[%s168_s27 + $0x10] sm:$0xff] (%p1549_p3)  }
  0x12   : > { %v192_v2 = vld [vmem:[%s168_s27 + $0x20] sm:$0xff] (%p1549_p3)   ;;  %185 = vst [vmem:[%s162_s28] sm:$0xff] (%p1549_p3), %v184_v0   ;;  %189 = vst [vmem:[%s162_s28 + $0x8] sm:$0xff] (%p1549_p3), %v188_v1   ;;  %v196_v3 = vld [vmem:[%s168_s27 + $0x30] sm:$0xff] (%p1549_p3)  }
  0x13   : > { %193 = vst [vmem:[%s162_s28 + $0x10] sm:$0xff] (%p1549_p3), %v192_v2   ;;  %197 = vst [vmem:[%s162_s28 + $0x18] sm:$0xff] (%p1549_p3), %v196_v3  }
  0x15 PF: > { %238 = sbr.rel (!%p1549_p3) target bundleno = 28 (0x1c), region = 61  ;;  %s240_s29 = sand.u32 (%p1549_p3), 1, %s1479_s13  }
  0x16   : > { %s1280_s30 = sshll.u32 (%p1549_p3), %s1487_s15, 3  ;;  %s1209_s4 = sshll.u32 (%p1549_p3), %s240_s29, 5 }
  0x17   : > { %s1112_s7 = scalar_lea.vmem (%p1549_p3), %s1701_s1, %s1280_s30  ;;  %s242_s8 = scalar_lea.vmem (%p1549_p3), [#allocation3], %s1209_s4 }
  0x18   : > { %v1212_v4 = vld [vmem:[%s1112_s7 + $0x40] sm:$0xff] (%p1549_p3)   ;;  %v1214_v5 = vld [vmem:[%s1112_s7 + $0x50] sm:$0xff] (%p1549_p3)  }
  0x19   : > { %v1216_v6 = vld [vmem:[%s1112_s7 + $0x60] sm:$0xff] (%p1549_p3)   ;;  %266 = vst [vmem:[%s242_s8] sm:$0xff] (%p1549_p3), %v1212_v4   ;;  %270 = vst [vmem:[%s242_s8 + $0x8] sm:$0xff] (%p1549_p3), %v1214_v5   ;;  %v1218_v7 = vld [vmem:[%s1112_s7 + $0x70] sm:$0xff] (%p1549_p3)  }
  0x1a   : > { %274 = vst [vmem:[%s242_s8 + $0x10] sm:$0xff] (%p1549_p3), %v1216_v6   ;;  %278 = vst [vmem:[%s242_s8 + $0x18] sm:$0xff] (%p1549_p3), %v1218_v7  }
  0x1c PF: > { %319 = sbr.rel (!%p1549_p3) target bundleno = 35 (0x23), region = 102  ;;  %s321_s9 = sand.u32 (%p1549_p3), 1, %s1479_s13  }
  0x1d   : > { %s1281_s10 = sshll.u32 (%p1549_p3), %s1487_s15, 3  ;;  %s1220_s11 = sshll.u32 (%p1549_p3), %s321_s9, 5 }
  0x1e   : > { %s1120_s22 = scalar_lea.vmem (%p1549_p3), %s1702_s2, %s1281_s10  ;;  %s323_s23 = scalar_lea.vmem (%p1549_p3), [#allocation4], %s1220_s11 }
  0x1f   : > { %v1223_v8 = vld [vmem:[%s1120_s22 + $0x80] sm:$0xff] (%p1549_p3)   ;;  %v1225_v9 = vld [vmem:[%s1120_s22 + $0x90] sm:$0xff] (%p1549_p3)  }
  0x20   : > { %v1227_v10 = vld [vmem:[%s1120_s22 + $0xa0] sm:$0xff] (%p1549_p3)   ;;  %347 = vst [vmem:[%s323_s23] sm:$0xff] (%p1549_p3), %v1223_v8   ;;  %351 = vst [vmem:[%s323_s23 + $0x8] sm:$0xff] (%p1549_p3), %v1225_v9   ;;  %v1229_v11 = vld [vmem:[%s1120_s22 + $0xb0] sm:$0xff] (%p1549_p3)  }
  0x21   : > { %355 = vst [vmem:[%s323_s23 + $0x10] sm:$0xff] (%p1549_p3), %v1227_v10   ;;  %359 = vst [vmem:[%s323_s23 + $0x18] sm:$0xff] (%p1549_p3), %v1229_v11  }
  0x23 PF: > { %p1231_p6 = scmp.ge.s32.totalorder %s1491_s16, 1  ;;  %p399_p7 = scmp.lt.s32.totalorder %s1491_s16, 3 }
  0x25   : > { %p400_p8 = pnand %p1231_p6, %p399_p7 }
  0x26   : > { %s406_s18 = sand.u32 (!%p400_p8), 1, %s1475_s12   ;;  %v1493_v12 = vmov (!%p400_p8), 0.0   ;;  %vm1494_vm0 = vmmov (!%p400_p8), 0   ;;  %vm491_vm1 = vcmask (!%p400_p8), 64512   ;;  %v471_v16 = vlaneseq (!%p400_p8)  ;;  %s1495_s27 = smov (!%p400_p8), 8  }
  0x27   : > { %403 = sbr.rel (%p400_p8) target bundleno = 1477 (0x5c5), region = 143  ;;  %1301 = vmatprep.subr.bf16.mxu0 (!%p400_p8), %v1493_v12  ;;  %s1585_s24 = sshll.u32 (!%p400_p8), %s406_s18, 5  ;;  %1303 = vmatprep.mubr.msk.bf16.mxu0 (!%p400_p8), %vm1494_vm0, %v1493_v12  ;;  %vm539_vm3 = vcmask (!%p400_p8), 130048   ;;  %vm1058_vm4 = vcmask (!%p400_p8), 195584   ;;  %vm1069_vm5 = vcmask (!%p400_p8), 257024  }
  0x28   : > { %1307 = vmatprep.subr.bf16.mxu1 (!%p400_p8), %v1493_v12  ;;  %1309 = vmatprep.mubr.msk.bf16.mxu1 (!%p400_p8), %vm1494_vm0, %v1493_v12  ;;  %s1593_s25 = scalar_lea.vmem (!%p400_p8), [#allocation3], %s1585_s24  ;;  %s1597_s12 = scalar_lea.vmem (!%p400_p8), [#allocation2], %s1585_s24  ;;  %v472_v17 = vand.u32 (!%p400_p8), 127, %v471_v16 }
  0x29   : > { %v1409_v13 = vld [vmem:[%s1593_s25] sm:$0xff] (!%p400_p8)   ;;  %s1615_s26 = scalar_lea.vmem (!%p400_p8), [#allocation4], %s1585_s24  ;;  %v1412_v41 = vld [vmem:[%s1593_s25 + $0x8] sm:$0xff] (!%p400_p8)   ;;  %v1414_v47 = vld [vmem:[%s1593_s25 + $0x10] sm:$0xff] (!%p400_p8)   ;;  %s1496_s28 = smov (!%p400_p8), 16  }
  0x2a   : > { %v496_v14 = vsel (!%p400_p8), %vm491_vm1, %v1409_v13, 0  ;;  %v1410_v15 = vld [vmem:[%s1597_s12] sm:$0xff] (!%p400_p8)   ;;  %vm473_vm2 = vcmp.ge.s32.totalorder (!%p400_p8), %v472_v17, 11  ;;  %v636_v46 = vsel (!%p400_p8), %vm491_vm1, %v1412_v41, 0  ;;  %v1413_v48 = vld [vmem:[%s1597_s12 + $0x8] sm:$0xff] (!%p400_p8)   ;;  %v775_v49 = vsel (!%p400_p8), %vm491_vm1, %v1414_v47, 0 }
  0x2b   : > { %1302 = vmatpush3.bf16.xpose.msra.mxu0 (!%p400_p8), %v496_v14  ;;  %v1606_v18 = vsel (!%p400_p8), %vm473_vm2, -1e+30, %v1493_v12  ;;  %v1411_v37 = vld [vmem:[%s1615_s26] sm:$0xff] (!%p400_p8)   ;;  %v1416_v50 = vld [vmem:[%s1593_s25 + $0x18] sm:$0xff] (!%p400_p8)   ;;  %v1415_v51 = vld [vmem:[%s1597_s12 + $0x10] sm:$0xff] (!%p400_p8)   ;;  %s1497_s29 = smov (!%p400_p8), 24  }
  0x2c   : > { %1319 = vmatprep.subr.bf16.mxu0 (!%p400_p8), %v1493_v12  ;;  %1308 = vmatpush3.bf16.msra.mxu1 (!%p400_p8), %v1411_v37  ;;  %v914_v52 = vsel (!%p400_p8), %vm491_vm1, %v1416_v50, 0  ;;  %v1417_v53 = vld [vmem:[%s1597_s12 + $0x18] sm:$0xff] (!%p400_p8)   ;;  %p462_p9 = scmp.lt.s32.totalorder (!%p400_p8), %s1483_s14, 1 }
  0x2d   : > { %1313 = vmatprep.subr.bf16.mxu1 (!%p400_p8), %v1493_v12 }
  0x2e   : > { %s1712_s14 = smov (!%p462_p9, %s1483_s14), 1 }
  0x2f   : > { %s1282_s30 = sshll.u32 %s1712_s14, 3 }
  0x30   : > { %s469_s6 = scalar_lea.vmem %s1703_s3, %s1282_s30 }
  0x32   : > { %1304 = vmatmul.mubr.msk.bf16.vlgmr.msra.gmra.mrb[0].mxu0 %vm491_vm1, %v1410_v15 }
  0x33   : > { %1321 = vmatprep.mubr.msk.bf16.mxu0 %vm1494_vm0, %v1493_v12 }
 0x105   : > { %v532_v19 = vpop.f32.mrb[0].mxu0 }
 0x106   : > { %v533_v20 = vadd.f32 %v532_v19, %v1606_v18  ;;  %v1305_v21 = vpop.f32.mrb[1].mxu0 }
 0x107   : > { %v535_v22 = vpop.f32.mrb[2].mxu0 }
 0x108   : > { %v536_v23 = vadd.f32 %v535_v22, %v1606_v18  ;;  %v1306_v24 = vpop.f32.mrb[3].mxu0  ;;  %v540_v25 = vsel %vm539_vm3, %v533_v20, -inf }
 0x109   : > { %541 = vmax.xlane.f32.xlu0 %v540_v25 }
 0x10a   : > { %v543_v26 = vsel %vm539_vm3, %v536_v23, -inf }
 0x10d   : > { %544 = vmax.xlane.f32.xlu0 %v543_v26 }
 0x196   : > { %v542_v27 = vpop.xlane.xlu0 %541 }
 0x197   : > { %v546_v28 = vsub.f32 %v533_v20, %v542_v27 }
 0x199   : > { %v548_v29 = vmul.f32 1.442695, %v546_v28 }
 0x19a   : > { %v545_v30 = vpop.xlane.xlu0 %544 }
 0x19b   : > { %1421 = vpow2.f32 %v548_v29  ;;  %v547_v31 = vsub.f32 %v536_v23, %v545_v30 }
 0x19d   : > { %v550_v32 = vmul.f32 1.442695, %v547_v31 }
 0x19f   : > { %1423 = vpow2.f32 %v550_v32 }
 0x1a5   : > { %v1422_v33 = vpop.eup %1421 }
 0x1a6   : > { %v552_v34 = vsel %vm539_vm3, %v1422_v33, 0.0 }
 0x1a7   : > { %553 = vadd.xlane.f32.xlu1 %v552_v34 }
 0x1a9   : > { %v1424_v35 = vpop.eup %1423 }
 0x1aa   : > { %v555_v36 = vsel %vm539_vm3, %v1424_v35, 0.0 }
 0x1ab   : > { %556 = vadd.xlane.f32.xlu1 %v555_v36 }
 0x234   : > { %v554_v38 = vpop.xlane.xlu1 %553 }
 0x235   : > { %1425 = vrcp.f32 %v554_v38 }
 0x238   : > { %v557_v39 = vpop.xlane.xlu1 %556 }
 0x239   : > { %1427 = vrcp.f32 %v557_v39 }
 0x23f   : > { %v1426_v40 = vpop.eup %1425 }
 0x240   : > { %v560_v43 = vmul.f32 %v1426_v40, %v1422_v33 }
 0x243   : > { %v1428_v42 = vpop.eup %1427 }
 0x244   : > { %v561_v44 = vmul.f32 %v1428_v42, %v1424_v35 }
 0x246   : > { %v562_v45 = vpack.c.bf16 %v561_v44, %v560_v43 }
 0x248   : > { %1310 = vmatmul.mubr.msk.bf16.vlgmr.msra.gmra.mrb[0].mxu1 %vm539_vm3, %v562_v45 }
 0x249   : > { %1314 = vmatpush3.bf16.xpose.msra.mxu1 %v636_v46  ;;  %1315 = vmatprep.mubr.msk.bf16.mxu1 %vm1494_vm0, %v1493_v12 }
 0x24a   : > { %1325 = vmatprep.subr.bf16.mxu1 %v1493_v12 }
 0x250   : > { %1316 = vmatmul.mubr.msk.bf16.vlgmr.msra.gmra.mrb[4].mxu1 %vm491_vm1, %v1413_v48 }
 0x251   : > { %1326 = vmatpush3.bf16.xpose.msra.mxu1 %v775_v49  ;;  %1327 = vmatprep.mubr.msk.bf16.mxu1 %vm1494_vm0, %v1493_v12  ;;  %v1418_v49 = vld [vmem:[%s1615_s26 + $0x8] sm:$0xff]  }
 0x252   : > { %1337 = vmatprep.subr.bf16.mxu1 %v1493_v12  ;;  %1320 = vmatpush3.bf16.msra.mxu0 %v1418_v49 }
 0x253   : > { %1331 = vmatprep.subr.bf16.mxu0 %v1493_v12 }
 0x258   : > { %1328 = vmatmul.mubr.msk.bf16.vlgmr.msra.gmra.mrb[8].mxu1 %vm491_vm1, %v1415_v51 }
 0x259   : > { %1338 = vmatpush3.bf16.xpose.msra.mxu1 %v914_v52  ;;  %1339 = vmatprep.mubr.msk.bf16.mxu1 %vm1494_vm0, %v1493_v12 }
 0x260   : > { %1340 = vmatmul.mubr.msk.bf16.vlgmr.msra.gmra.mrb[12].mxu1 %vm491_vm1, %v1417_v53 }
 0x31b   : > { %v1640_v54 = vpop.f32.mrb[0].mxu1 }
 0x31c   : > { %v1311_v55 = vpop.f32.mrb[1].mxu1 }
 0x31d   : > { %v1642_v56 = vpop.f32.mrb[2].mxu1 }
 0x31e   : > { %v1312_v57 = vpop.f32.mrb[3].mxu1 }
 0x323   : > { %v672_v58 = vpop.f32.mrb[4].mxu1 }
 0x324   : > { %v673_v59 = vadd.f32 %v672_v58, %v1606_v18  ;;  %v1317_v60 = vpop.f32.mrb[5].mxu1 }
 0x325   : > { %v675_v61 = vpop.f32.mrb[6].mxu1  ;;  %v1419_v60 = vld [vmem:[%s1615_s26 + $0x10] sm:$0xff]  }
 0x326   : > { %v676_v62 = vadd.f32 %v675_v61, %v1606_v18  ;;  %v1318_v63 = vpop.f32.mrb[7].mxu1  ;;  %v679_v0 = vsel %vm539_vm3, %v673_v59, -inf }
 0x327   : > { %680 = vmax.xlane.f32.xlu0 %v679_v0 }
 0x328   : > { %v682_v1 = vsel %vm539_vm3, %v676_v62, -inf }
 0x329   : > { %683 = vmax.xlane.f32.xlu1 %v682_v1 }
 0x32b   : > { %v811_v2 = vpop.f32.mrb[8].mxu1 }
 0x32c   : > { %v812_v3 = vadd.f32 %v811_v2, %v1606_v18  ;;  %v1329_v4 = vpop.f32.mrb[9].mxu1 }
 0x32d   : > { %v814_v5 = vpop.f32.mrb[10].mxu1  ;;  %v1420_v4 = vld [vmem:[%s1615_s26 + $0x18] sm:$0xff]  }
 0x32e   : > { %v815_v6 = vadd.f32 %v814_v5, %v1606_v18  ;;  %v1330_v7 = vpop.f32.mrb[11].mxu1  ;;  %v818_v8 = vsel %vm539_vm3, %v812_v3, -inf }
 0x32f   : > { %819 = vmax.xlane.f32.xlu0 %v818_v8 }
 0x330   : > { %v821_v9 = vsel %vm539_vm3, %v815_v6, -inf }
 0x331   : > { %822 = vmax.xlane.f32.xlu1 %v821_v9 }
 0x333   : > { %v950_v10 = vpop.f32.mrb[12].mxu1 }
 0x334   : > { %v951_v11 = vadd.f32 %v950_v10, %v1606_v18  ;;  %v1341_v13 = vpop.f32.mrb[13].mxu1 }
 0x335   : > { %v953_v14 = vpop.f32.mrb[14].mxu1 }
 0x336   : > { %v954_v15 = vadd.f32 %v953_v14, %v1606_v18  ;;  %v1342_v16 = vpop.f32.mrb[15].mxu1  ;;  %v957_v17 = vsel %vm539_vm3, %v951_v11, -inf }
 0x337   : > { %958 = vmax.xlane.f32.xlu0 %v957_v17 }
 0x338   : > { %v960_v19 = vsel %vm539_vm3, %v954_v15, -inf }
 0x339   : > { %961 = vmax.xlane.f32.xlu1 %v960_v19 }
 0x3b4   : > { %v681_v20 = vpop.xlane.xlu0 %680 }
 0x3b5   : > { %v685_v21 = vsub.f32 %v673_v59, %v681_v20 }
 0x3b6   : > { %v684_v22 = vpop.xlane.xlu1 %683 }
 0x3b7   : > { %v687_v23 = vmul.f32 1.442695, %v685_v21  ;;  %v686_v24 = vsub.f32 %v676_v62, %v684_v22 }
 0x3b9   : > { %1429 = vpow2.f32 %v687_v23  ;;  %v689_v25 = vmul.f32 1.442695, %v686_v24 }
 0x3bb   : > { %1431 = vpow2.f32 %v689_v25 }
 0x3bc   : > { %v820_v26 = vpop.xlane.xlu0 %819 }
 0x3bd   : > { %v824_v27 = vsub.f32 %v812_v3, %v820_v26 }
 0x3be   : > { %v823_v28 = vpop.xlane.xlu1 %822 }
 0x3bf   : > { %v826_v29 = vmul.f32 1.442695, %v824_v27  ;;  %v825_v18 = vsub.f32 %v815_v6, %v823_v28 }
 0x3c1   : > { %1433 = vpow2.f32 %v826_v29  ;;  %v828_v30 = vmul.f32 1.442695, %v825_v18 }
 0x3c3   : > { %v1430_v31 = vpop.eup %1429  ;;  %1435 = vpow2.f32 %v828_v30 }
 0x3c4   : > { %v959_v32 = vpop.xlane.xlu0 %958  ;;  %v691_v33 = vsel %vm539_vm3, %v1430_v31, 0.0 }
 0x3c5   : > { %v1432_v34 = vpop.eup %1431  ;;  %v963_v35 = vsub.f32 %v951_v11, %v959_v32  ;;  %692 = vadd.xlane.f32.xlu0 %v691_v33 }
 0x3c6   : > { %v962_v36 = vpop.xlane.xlu1 %961  ;;  %v694_v37 = vsel %vm539_vm3, %v1432_v34, 0.0 }
 0x3c7   : > { %v965_v38 = vmul.f32 1.442695, %v963_v35  ;;  %v964_v39 = vsub.f32 %v954_v15, %v962_v36  ;;  %695 = vadd.xlane.f32.xlu1 %v694_v37 }
 0x3c9   : > { %1437 = vpow2.f32 %v965_v38  ;;  %v967_v40 = vmul.f32 1.442695, %v964_v39 }
 0x3cb   : > { %v1434_v41 = vpop.eup %1433  ;;  %1439 = vpow2.f32 %v967_v40 }
 0x3cc   : > { %v830_v42 = vsel %vm539_vm3, %v1434_v41, 0.0 }
 0x3cd   : > { %v1436_v43 = vpop.eup %1435  ;;  %831 = vadd.xlane.f32.xlu0 %v830_v42 }
 0x3ce   : > { %v833_v44 = vsel %vm539_vm3, %v1436_v43, 0.0 }
 0x3cf   : > { %834 = vadd.xlane.f32.xlu1 %v833_v44 }
 0x3d3   : > { %v1438_v45 = vpop.eup %1437 }
 0x3d4   : > { %v969_v46 = vsel %vm539_vm3, %v1438_v45, 0.0 }
 0x3d5   : > { %v1440_v47 = vpop.eup %1439  ;;  %970 = vadd.xlane.f32.xlu0 %v969_v46 }
 0x3d6   : > { %v972_v48 = vsel %vm539_vm3, %v1440_v47, 0.0 }
 0x3d7   : > { %973 = vadd.xlane.f32.xlu1 %v972_v48 }
 0x452   : > { %v693_v50 = vpop.xlane.xlu0 %692 }
 0x453   : > { %1441 = vrcp.f32 %v693_v50 }
 0x454   : > { %v696_v51 = vpop.xlane.xlu1 %695 }
 0x455   : > { %1443 = vrcp.f32 %v696_v51 }
 0x45a   : > { %v832_v52 = vpop.xlane.xlu0 %831 }
 0x45b   : > { %1445 = vrcp.f32 %v832_v52 }
 0x45c   : > { %v835_v53 = vpop.xlane.xlu1 %834 }
 0x45d   : > { %v1442_v55 = vpop.eup %1441  ;;  %1447 = vrcp.f32 %v835_v53 }
 0x45e   : > { %v699_v58 = vmul.f32 %v1442_v55, %v1430_v31 }
 0x45f   : > { %v1444_v57 = vpop.eup %1443 }
 0x460   : > { %v700_v59 = vmul.f32 %v1444_v57, %v1432_v34 }
 0x462   : > { %v971_v61 = vpop.xlane.xlu0 %970  ;;  %v701_v62 = vpack.c.bf16 %v700_v59, %v699_v58 }
 0x463   : > { %1449 = vrcp.f32 %v971_v61 }
 0x464   : > { %1322 = vmatmul.mubr.msk.bf16.vlgmr.msra.gmra.mrb[4].mxu0 %vm539_vm3, %v701_v62  ;;  %v974_v63 = vpop.xlane.xlu1 %973 }
 0x465   : > { %v1446_v0 = vpop.eup %1445  ;;  %1332 = vmatpush3.bf16.msra.mxu0 %v1419_v60  ;;  %1451 = vrcp.f32 %v974_v63  ;;  %1333 = vmatprep.mubr.msk.bf16.mxu0 %vm1494_vm0, %v1493_v12 }
 0x466   : > { %1343 = vmatprep.subr.bf16.mxu0 %v1493_v12  ;;  %v838_v2 = vmul.f32 %v1446_v0, %v1434_v41 }
 0x467   : > { %v1448_v1 = vpop.eup %1447 }
 0x468   : > { %v839_v3 = vmul.f32 %v1448_v1, %v1436_v43 }
 0x46a   : > { %v840_v5 = vpack.c.bf16 %v839_v3, %v838_v2 }
 0x46c   : > { %1334 = vmatmul.mubr.msk.bf16.vlgmr.msra.gmra.mrb[8].mxu0 %vm539_vm3, %v840_v5 }
 0x46d   : > { %v1450_v6 = vpop.eup %1449  ;;  %1344 = vmatpush3.bf16.msra.mxu0 %v1420_v4  ;;  %1345 = vmatprep.mubr.msk.bf16.mxu0 %vm1494_vm0, %v1493_v12 }
 0x46e   : > { %v977_v8 = vmul.f32 %v1450_v6, %v1438_v45 }
 0x46f   : > { %v1452_v7 = vpop.eup %1451 }
 0x470   : > { %v978_v9 = vmul.f32 %v1452_v7, %v1440_v47 }
 0x472   : > { %v979_v10 = vpack.c.bf16 %v978_v9, %v977_v8 }
 0x474   : > { %1346 = vmatmul.mubr.msk.bf16.vlgmr.msra.gmra.mrb[12].mxu0 %vm539_vm3, %v979_v10 }
 0x537   : > { %v745_v11 = vpop.f32.mrb[4].mxu0 }
 0x538   : > { %v1323_v13 = vpop.f32.mrb[5].mxu0 }
 0x539   : > { %v748_v14 = vpop.f32.mrb[6].mxu0 }
 0x53a   : > { %v1394_v15 = vpack.i.bf16 %v748_v14, %v745_v11  ;;  %v1324_v16 = vpop.f32.mrb[7].mxu0 }
 0x53c   : > { %1395 = vrot.lane.b32.xlu0 %v1394_v15, %s1495_s27 }
 0x53f   : > { %v884_v17 = vpop.f32.mrb[8].mxu0 }
 0x540   : > { %v1335_v19 = vpop.f32.mrb[9].mxu0 }
 0x541   : > { %v887_v20 = vpop.f32.mrb[10].mxu0 }
 0x542   : > { %v1399_v21 = vpack.i.bf16 %v887_v20, %v884_v17  ;;  %v1336_v12 = vpop.f32.mrb[11].mxu0 }
 0x544   : > { %1400 = vrot.lane.b32.xlu1 %v1399_v21, %s1496_s28 }
 0x547   : > { %v1023_v22 = vpop.f32.mrb[12].mxu0 }
 0x548   : > { %v1347_v23 = vpop.f32.mrb[13].mxu0 }
 0x549   : > { %v1026_v24 = vpop.f32.mrb[14].mxu0 }
 0x54a   : > { %v1404_v25 = vpack.i.bf16 %v1026_v24, %v1023_v22  ;;  %v1348_v26 = vpop.f32.mrb[15].mxu0 }
 0x54c   : > { %1405 = vrot.lane.b32.xlu1 %v1404_v25, %s1497_s29 }
 0x5ae   : > { %v1396_v27 = vpop.permute.xlu0 %1395 }
 0x5af   : > { %v1398_v29 = vunpack.i.h.bf16 %v1396_v27  ;;  %v1397_v18 = vunpack.i.l.bf16 %v1396_v27 }
 0x5b1   : > { %v1055_v33 = vsel %vm491_vm1, %v1642_v56, %v1398_v29  ;;  %v1054_v34 = vsel %vm491_vm1, %v1640_v54, %v1397_v18 }
 0x5b6   : > { %v1401_v28 = vpop.permute.xlu1 %1400 }
 0x5b7   : > { %v1403_v30 = vunpack.i.h.bf16 %v1401_v28  ;;  %v1402_v31 = vunpack.i.l.bf16 %v1401_v28 }
 0x5b9   : > { %v1057_v37 = vsel %vm539_vm3, %v1055_v33, %v1403_v30  ;;  %v1056_v38 = vsel %vm539_vm3, %v1054_v34, %v1402_v31 }
 0x5be   : > { %v1406_v32 = vpop.permute.xlu1 %1405 }
 0x5bf   : > { %v1408_v35 = vunpack.i.h.bf16 %v1406_v32  ;;  %v1407_v36 = vunpack.i.l.bf16 %v1406_v32 }
 0x5c1   : > { %v1060_v39 = vsel %vm1058_vm4, %v1057_v37, %v1408_v35  ;;  %v1059_v40 = vsel %vm1058_vm4, %v1056_v38, %v1407_v36 }
 0x5c2   : > { %v1284_v41 = vpack.c.bf16 %v1060_v39, %v1060_v39  ;;  %v1283_v42 = vpack.c.bf16 %v1059_v40, %v1059_v40 }
 0x5c4   : > { %1071 = vst.msk [vmem:[%s469_s6 + $0x4] sm:$0xf] %vm1069_vm5, %v1284_v41  ;;  %1070 = vst.msk [vmem:[%s469_s6] sm:$0xf] %vm1069_vm5, %v1283_v42 }
 0x5c5 PF: > { %s13_s16 = sadd.s32 1, %s1491_s16   ;;  %s1705_s12 = smov %s1479_s13 }
 0x5c6   : > { %p10_p10 = scmp.ge.s32.totalorder %s13_s16, 4   ;;  %s1706_s13 = smov %s1557_s21 }
 0x5c7   : > { %s1707_s14 = smov %s1487_s15  ;;  %s1708_s15 = smov %s1710_s17 }
 0x5c8   :  { %12 = sbr.rel (!%p10_p10) target bundleno = 3 (0x3), region = 215 }

// kernel: _lambda_.11
= control target key start
LH: loop header
LB: loop body
LE: loop exit
PB: predicated region body
PF: predicated region fallthrough
CT: control target
= control target key end

     0   :  { %vm29_vm0 = vcmask 261120   ;;  %vm201_vm1 = vcmask 60416   ;;  %s498_s30 = smov 112   ;;  %s500_s12 = smov 104   ;;  %s782_s0 = inlined_call_operand.vmem [shape: bf16[32,32], index: 0, kind: input, shape index: {}]   ;;  %s783_s3 = inlined_call_operand.vmem [shape: bf16[32,96], index: 3, kind: input, shape index: {}]   ;;  %s784_s1 = inlined_call_operand.vmem [shape: f32[1,32], index: 1, kind: input, shape index: {}]   ;;  %s785_s2 = inlined_call_operand.vmem [shape: f32[1,32], index: 2, kind: input, shape index: {}]   ;;  %s786_s4 = inlined_call_operand.vmem [shape: f32[1,96], index: 4, kind: input, shape index: {}]   ;;  %s787_s5 = inlined_call_operand.vmem [shape: bf16[12,32,8], index: 5, kind: output, shape index: {}]  }
   0x1   :  { %v457_v0 = vld [vmem:[%s782_s0] sm:$0xff]   ;;  %v464_v1 = vld [vmem:[%s782_s0 + $0x8] sm:$0xff]   ;;  %s501_s13 = smov 96   ;;  %s502_s14 = smov 88  }
   0x2   :  { %v458_v2 = vunpack.c.l.bf16 %v457_v0  ;;  %v462_v3 = vunpack.c.l.bf16 %v464_v1  ;;  %v459_v4 = vunpack.c.h.bf16 %v457_v0  ;;  %v463_v5 = vunpack.c.h.bf16 %v464_v1  ;;  %v488_v30 = vld [vmem:[%s783_s3] sm:$0xff]   ;;  %v489_v31 = vld [vmem:[%s783_s3 + $0x8] sm:$0xff]   ;;  %s503_s15 = smov 80   ;;  %s504_s16 = smov 72  }
   0x3   :  { %469 = vmatprep.subr.bf16.mxu0 %v488_v30  ;;  %v397_v46 = vld [vmem:[%s784_s1] ss:$0 sm:$0xff]  ;;  %s505_s17 = smov 64   ;;  %s506_s18 = smov 56  }
   0x4   :  { %v30_v6 = vsel %vm29_vm0, %v458_v2, 0.0  ;;  %v36_v7 = vsel %vm29_vm0, %v462_v3, 0.0  ;;  %v33_v8 = vsel %vm29_vm0, %v459_v4, 0.0  ;;  %v39_v9 = vsel %vm29_vm0, %v463_v5, 0.0  ;;  %470 = vmatpush3.bf16.msra.mxu0 %v488_v30  ;;  %v398_v52 = vld [vmem:[%s785_s2] ss:$0 sm:$0xff] }
   0x5   :  { %31 = vadd.xlane.f32.xlu0 %v30_v6  ;;  %37 = vadd.xlane.f32.xlu1 %v36_v7  ;;  %v399_v0 = vld [vmem:[%s786_s4] ss:$0 sm:$0xff]  ;;  %s499_s4 = smov 120   ;;  %s507_s19 = smov 48  }
   0x6   :  { %471 = vmatprep.subr.bf16.mxu0 %v489_v31  ;;  %s508_s20 = smov 40  }
   0x8   :  { %472 = vmatpush3.bf16.msra.mxu0 %v489_v31 }
   0x9   :  { %34 = vadd.xlane.f32.xlu0 %v33_v8  ;;  %40 = vadd.xlane.f32.xlu1 %v39_v9 }
  0x92   :  { %v32_v10 = vpop.xlane.xlu0 %31  ;;  %v38_v11 = vpop.xlane.xlu1 %37 }
  0x93   :  { %v43_v12 = vmul.f32 0.03125, %v32_v10  ;;  %v45_v13 = vmul.f32 0.03125, %v38_v11 }
  0x95   :  { %v47_v14 = vsub.f32 %v458_v2, %v43_v12  ;;  %v49_v15 = vsub.f32 %v462_v3, %v45_v13 }
  0x96   :  { %v35_v16 = vpop.xlane.xlu0 %34  ;;  %v41_v17 = vpop.xlane.xlu1 %40 }
  0x97   :  { %v44_v18 = vmul.f32 0.03125, %v35_v16  ;;  %v46_v19 = vmul.f32 0.03125, %v41_v17  ;;  %v51_v20 = vmul.f32 %v47_v14, %v47_v14  ;;  %v53_v21 = vmul.f32 %v49_v15, %v49_v15 }
  0x99   :  { %v48_v22 = vsub.f32 %v459_v4, %v44_v18  ;;  %v50_v23 = vsub.f32 %v463_v5, %v46_v19  ;;  %v55_v24 = vsel %vm29_vm0, %v51_v20, 0.0  ;;  %v61_v25 = vsel %vm29_vm0, %v53_v21, 0.0 }
  0x9a   :  { %56 = vadd.xlane.f32.xlu0 %v55_v24 }
  0x9b   :  { %v52_v26 = vmul.f32 %v48_v22, %v48_v22  ;;  %v54_v27 = vmul.f32 %v50_v23, %v50_v23 }
  0x9d   :  { %v58_v28 = vsel %vm29_vm0, %v52_v26, 0.0  ;;  %v64_v29 = vsel %vm29_vm0, %v54_v27, 0.0 }
  0x9e   :  { %62 = vadd.xlane.f32.xlu0 %v61_v25  ;;  %59 = vadd.xlane.f32.xlu1 %v58_v28 }
  0xa2   :  { %65 = vadd.xlane.f32.xlu1 %v64_v29 }
 0x127   :  { %v57_v32 = vpop.xlane.xlu0 %56 }
 0x128   :  { %v67_v33 = vmul.f32 0.03125, %v57_v32 }
 0x12a   :  { %v71_v34 = vadd.f32 1e-05, %v67_v33 }
 0x12b   :  { %v60_v35 = vpop.xlane.xlu1 %59  ;;  %v63_v36 = vpop.xlane.xlu0 %62 }
 0x12c   :  { %490 = vrsqrt.f32 %v71_v34  ;;  %v68_v37 = vmul.f32 0.03125, %v60_v35  ;;  %v69_v38 = vmul.f32 0.03125, %v63_v36 }
 0x12e   :  { %v72_v39 = vadd.f32 1e-05, %v68_v37  ;;  %v73_v40 = vadd.f32 1e-05, %v69_v38 }
 0x12f   :  { %v66_v41 = vpop.xlane.xlu1 %65 }
 0x130   :  { %492 = vrsqrt.f32 %v72_v39  ;;  %v70_v42 = vmul.f32 0.03125, %v66_v41 }
 0x131   :  { %494 = vrsqrt.f32 %v73_v40 }
 0x132   :  { %v74_v43 = vadd.f32 1e-05, %v70_v42 }
 0x134   :  { %496 = vrsqrt.f32 %v74_v43 }
 0x136   :  { %v491_v44 = vpop.eup %490 }
 0x137   :  { %v79_v45 = vmul.f32 %v491_v44, %v47_v14 }
 0x139   :  { %v90_v50 = vmul.f32 %v397_v46, %v79_v45 }
 0x13a   :  { %v493_v47 = vpop.eup %492 }
 0x13b   :  { %v495_v48 = vpop.eup %494  ;;  %v80_v49 = vmul.f32 %v493_v47, %v48_v22  ;;  %v101_v56 = vadd.f32 %v398_v52, %v90_v50 }
 0x13c   :  { %v81_v51 = vmul.f32 %v495_v48, %v49_v15 }
 0x13d   :  { %v91_v53 = vmul.f32 %v397_v46, %v80_v49 }
 0x13e   :  { %v497_v54 = vpop.eup %496  ;;  %v92_v58 = vmul.f32 %v397_v46, %v81_v51 }
 0x13f   :  { %v82_v55 = vmul.f32 %v497_v54, %v50_v23  ;;  %v102_v57 = vadd.f32 %v398_v52, %v91_v53 }
 0x140   :  { %v103_v61 = vadd.f32 %v398_v52, %v92_v58 }
 0x141   :  { %v105_v59 = vpack.c.bf16 %v102_v57, %v101_v56  ;;  %v93_v60 = vmul.f32 %v397_v46, %v82_v55 }
 0x143   :  { %473 = vmatprep.mubr.msk.bf16.mxu0 %vm29_vm0, %v105_v59  ;;  %v104_v62 = vadd.f32 %v398_v52, %v93_v60 }
 0x145   :  { %v106_v63 = vpack.c.bf16 %v104_v62, %v103_v61 }
 0x147   :  { %474 = vmatmul.mubr.msk.bf16.vlgmr.msra.gmra.mrb[0].mxu0 %vm29_vm0, %v106_v63 }
 0x21a   :  { %v475_v1 = vpop.f32.mrb[0].mxu0 }
 0x21b   :  { %v179_v2 = vadd.f32 %v475_v1, %v399_v0  ;;  %v170_v3 = vpop.f32.mrb[1].mxu0 }
 0x21c   :  { %v171_v4 = vadd.f32 %v399_v0, %v170_v3  ;;  %v476_v5 = vpop.f32.mrb[2].mxu0 }
 0x21d   :  { %v454_v6 = vpack.c.bf16 %v179_v2, %v179_v2  ;;  %v182_v7 = vadd.f32 %v476_v5, %v399_v0  ;;  %v173_v8 = vpop.f32.mrb[3].mxu0 }
 0x21e   :  { %v452_v9 = vpack.c.bf16 %v171_v4, %v171_v4  ;;  %v174_v10 = vadd.f32 %v399_v0, %v173_v8 }
 0x21f   :  { %204 = vst.msk [vmem:[%s787_s5 + $0x8] sm:$0xf] %vm201_vm1, %v454_v6  ;;  %v455_v11 = vpack.c.bf16 %v182_v7, %v182_v7  ;;  %227 = vrot.lane.b32.xlu0 %v454_v6, %s498_s30  ;;  %210 = vrot.lane.b32.xlu1 %v454_v6, %s499_s4 }
 0x220   :  { %202 = vst.msk [vmem:[%s787_s5] sm:$0xf] %vm201_vm1, %v452_v9  ;;  %v453_v12 = vpack.c.bf16 %v174_v10, %v174_v10 }
 0x221   :  { %205 = vst.msk [vmem:[%s787_s5 + $0xc] sm:$0xf] %vm201_vm1, %v455_v11 }
 0x222   :  { %203 = vst.msk [vmem:[%s787_s5 + $0x4] sm:$0xf] %vm201_vm1, %v453_v12 }
 0x223   :  { %244 = vrot.lane.b32.xlu0 %v454_v6, %s500_s12  ;;  %212 = vrot.lane.b32.xlu1 %v455_v11, %s499_s4 }
 0x227   :  { %261 = vrot.lane.b32.xlu0 %v454_v6, %s501_s13  ;;  %229 = vrot.lane.b32.xlu1 %v455_v11, %s498_s30 }
 0x22b   :  { %278 = vrot.lane.b32.xlu0 %v454_v6, %s502_s14  ;;  %246 = vrot.lane.b32.xlu1 %v455_v11, %s500_s12 }
 0x22f   :  { %295 = vrot.lane.b32.xlu0 %v454_v6, %s503_s15  ;;  %263 = vrot.lane.b32.xlu1 %v455_v11, %s501_s13 }
 0x233   :  { %312 = vrot.lane.b32.xlu0 %v454_v6, %s504_s16  ;;  %280 = vrot.lane.b32.xlu1 %v455_v11, %s502_s14 }
 0x237   :  { %329 = vrot.lane.b32.xlu0 %v454_v6, %s505_s17  ;;  %297 = vrot.lane.b32.xlu1 %v455_v11, %s503_s15 }
 0x23b   :  { %346 = vrot.lane.b32.xlu0 %v454_v6, %s506_s18  ;;  %314 = vrot.lane.b32.xlu1 %v455_v11, %s504_s16 }
 0x23f   :  { %363 = vrot.lane.b32.xlu0 %v454_v6, %s507_s19  ;;  %331 = vrot.lane.b32.xlu1 %v455_v11, %s505_s17 }
 0x243   :  { %348 = vrot.lane.b32.xlu1 %v455_v11, %s506_s18  ;;  %206 = vrot.lane.b32.xlu0 %v452_v9, %s499_s4 }
 0x247   :  { %365 = vrot.lane.b32.xlu1 %v455_v11, %s507_s19  ;;  %223 = vrot.lane.b32.xlu0 %v452_v9, %s498_s30 }
 0x24b   :  { %208 = vrot.lane.b32.xlu1 %v453_v12, %s499_s4  ;;  %240 = vrot.lane.b32.xlu0 %v452_v9, %s500_s12 }
 0x24f   :  { %225 = vrot.lane.b32.xlu1 %v453_v12, %s498_s30  ;;  %257 = vrot.lane.b32.xlu0 %v452_v9, %s501_s13 }
 0x253   :  { %242 = vrot.lane.b32.xlu1 %v453_v12, %s500_s12  ;;  %274 = vrot.lane.b32.xlu0 %v452_v9, %s502_s14 }
 0x257   :  { %259 = vrot.lane.b32.xlu1 %v453_v12, %s501_s13  ;;  %291 = vrot.lane.b32.xlu0 %v452_v9, %s503_s15 }
 0x25b   :  { %276 = vrot.lane.b32.xlu1 %v453_v12, %s502_s14  ;;  %308 = vrot.lane.b32.xlu0 %v452_v9, %s504_s16 }
 0x25f   :  { %293 = vrot.lane.b32.xlu1 %v453_v12, %s503_s15  ;;  %325 = vrot.lane.b32.xlu0 %v452_v9, %s505_s17 }
 0x263   :  { %310 = vrot.lane.b32.xlu1 %v453_v12, %s504_s16  ;;  %342 = vrot.lane.b32.xlu0 %v452_v9, %s506_s18 }
 0x267   :  { %327 = vrot.lane.b32.xlu1 %v453_v12, %s505_s17  ;;  %359 = vrot.lane.b32.xlu0 %v452_v9, %s507_s19 }
 0x26b   :  { %344 = vrot.lane.b32.xlu1 %v453_v12, %s506_s18  ;;  %376 = vrot.lane.b32.xlu0 %v452_v9, %s508_s20 }
 0x26f   :  { %361 = vrot.lane.b32.xlu1 %v453_v12, %s507_s19  ;;  %380 = vrot.lane.b32.xlu0 %v454_v6, %s508_s20 }
 0x273   :  { %378 = vrot.lane.b32.xlu1 %v453_v12, %s508_s20 }
 0x277   :  { %382 = vrot.lane.b32.xlu1 %v455_v11, %s508_s20 }
 0x291   :  { %v228_v13 = vpop.permute.xlu0 %227  ;;  %v211_v14 = vpop.permute.xlu1 %210 }
 0x292   :  { %414 = vst.msk [vmem:[%s787_s5 + $0x28] sm:$0xf] %vm201_vm1, %v228_v13  ;;  %410 = vst.msk [vmem:[%s787_s5 + $0x18] sm:$0xf] %vm201_vm1, %v211_v14 }
 0x295   :  { %v245_v15 = vpop.permute.xlu0 %244  ;;  %v213_v16 = vpop.permute.xlu1 %212 }
 0x296   :  { %418 = vst.msk [vmem:[%s787_s5 + $0x38] sm:$0xf] %vm201_vm1, %v245_v15  ;;  %411 = vst.msk [vmem:[%s787_s5 + $0x1c] sm:$0xf] %vm201_vm1, %v213_v16 }
 0x299   :  { %v262_v17 = vpop.permute.xlu0 %261  ;;  %v230_v18 = vpop.permute.xlu1 %229 }
 0x29a   :  { %422 = vst.msk [vmem:[%s787_s5 + $0x48] sm:$0xf] %vm201_vm1, %v262_v17  ;;  %415 = vst.msk [vmem:[%s787_s5 + $0x2c] sm:$0xf] %vm201_vm1, %v230_v18 }
 0x29d   :  { %v279_v19 = vpop.permute.xlu0 %278  ;;  %v247_v20 = vpop.permute.xlu1 %246 }
 0x29e   :  { %426 = vst.msk [vmem:[%s787_s5 + $0x58] sm:$0xf] %vm201_vm1, %v279_v19  ;;  %419 = vst.msk [vmem:[%s787_s5 + $0x3c] sm:$0xf] %vm201_vm1, %v247_v20 }
 0x2a1   :  { %v296_v21 = vpop.permute.xlu0 %295  ;;  %v264_v22 = vpop.permute.xlu1 %263 }
 0x2a2   :  { %430 = vst.msk [vmem:[%s787_s5 + $0x68] sm:$0xf] %vm201_vm1, %v296_v21  ;;  %423 = vst.msk [vmem:[%s787_s5 + $0x4c] sm:$0xf] %vm201_vm1, %v264_v22 }
 0x2a5   :  { %v313_v23 = vpop.permute.xlu0 %312  ;;  %v281_v24 = vpop.permute.xlu1 %280 }
 0x2a6   :  { %434 = vst.msk [vmem:[%s787_s5 + $0x78] sm:$0xf] %vm201_vm1, %v313_v23  ;;  %427 = vst.msk [vmem:[%s787_s5 + $0x5c] sm:$0xf] %vm201_vm1, %v281_v24 }
 0x2a9   :  { %v330_v25 = vpop.permute.xlu0 %329  ;;  %v298_v26 = vpop.permute.xlu1 %297 }
 0x2aa   :  { %438 = vst.msk [vmem:[%s787_s5 + $0x88] sm:$0xf] %vm201_vm1, %v330_v25  ;;  %431 = vst.msk [vmem:[%s787_s5 + $0x6c] sm:$0xf] %vm201_vm1, %v298_v26 }
 0x2ad   :  { %v347_v27 = vpop.permute.xlu0 %346  ;;  %v315_v28 = vpop.permute.xlu1 %314 }
 0x2ae   :  { %442 = vst.msk [vmem:[%s787_s5 + $0x98] sm:$0xf] %vm201_vm1, %v347_v27  ;;  %435 = vst.msk [vmem:[%s787_s5 + $0x7c] sm:$0xf] %vm201_vm1, %v315_v28 }
 0x2b1   :  { %v364_v29 = vpop.permute.xlu0 %363  ;;  %v332_v30 = vpop.permute.xlu1 %331 }
 0x2b2   :  { %446 = vst.msk [vmem:[%s787_s5 + $0xa8] sm:$0xf] %vm201_vm1, %v364_v29  ;;  %439 = vst.msk [vmem:[%s787_s5 + $0x8c] sm:$0xf] %vm201_vm1, %v332_v30 }
 0x2b5   :  { %v349_v31 = vpop.permute.xlu1 %348  ;;  %v207_v32 = vpop.permute.xlu0 %206 }
 0x2b6   :  { %443 = vst.msk [vmem:[%s787_s5 + $0x9c] sm:$0xf] %vm201_vm1, %v349_v31  ;;  %408 = vst.msk [vmem:[%s787_s5 + $0x10] sm:$0xf] %vm201_vm1, %v207_v32 }
 0x2b9   :  { %v366_v33 = vpop.permute.xlu1 %365  ;;  %v224_v34 = vpop.permute.xlu0 %223 }
 0x2ba   :  { %447 = vst.msk [vmem:[%s787_s5 + $0xac] sm:$0xf] %vm201_vm1, %v366_v33  ;;  %412 = vst.msk [vmem:[%s787_s5 + $0x20] sm:$0xf] %vm201_vm1, %v224_v34 }
 0x2bd   :  { %v209_v35 = vpop.permute.xlu1 %208  ;;  %v241_v36 = vpop.permute.xlu0 %240 }
 0x2be   :  { %409 = vst.msk [vmem:[%s787_s5 + $0x14] sm:$0xf] %vm201_vm1, %v209_v35  ;;  %416 = vst.msk [vmem:[%s787_s5 + $0x30] sm:$0xf] %vm201_vm1, %v241_v36 }
 0x2c1   :  { %v226_v37 = vpop.permute.xlu1 %225  ;;  %v258_v38 = vpop.permute.xlu0 %257 }
 0x2c2   :  { %413 = vst.msk [vmem:[%s787_s5 + $0x24] sm:$0xf] %vm201_vm1, %v226_v37  ;;  %420 = vst.msk [vmem:[%s787_s5 + $0x40] sm:$0xf] %vm201_vm1, %v258_v38 }
 0x2c5   :  { %v243_v39 = vpop.permute.xlu1 %242  ;;  %v275_v40 = vpop.permute.xlu0 %274 }
 0x2c6   :  { %417 = vst.msk [vmem:[%s787_s5 + $0x34] sm:$0xf] %vm201_vm1, %v243_v39  ;;  %424 = vst.msk [vmem:[%s787_s5 + $0x50] sm:$0xf] %vm201_vm1, %v275_v40 }
 0x2c9   :  { %v260_v41 = vpop.permute.xlu1 %259  ;;  %v292_v42 = vpop.permute.xlu0 %291 }
 0x2ca   :  { %421 = vst.msk [vmem:[%s787_s5 + $0x44] sm:$0xf] %vm201_vm1, %v260_v41  ;;  %428 = vst.msk [vmem:[%s787_s5 + $0x60] sm:$0xf] %vm201_vm1, %v292_v42 }
 0x2cd   :  { %v277_v43 = vpop.permute.xlu1 %276  ;;  %v309_v44 = vpop.permute.xlu0 %308 }
 0x2ce   :  { %425 = vst.msk [vmem:[%s787_s5 + $0x54] sm:$0xf] %vm201_vm1, %v277_v43  ;;  %432 = vst.msk [vmem:[%s787_s5 + $0x70] sm:$0xf] %vm201_vm1, %v309_v44 }
 0x2d1   :  { %v294_v45 = vpop.permute.xlu1 %293  ;;  %v326_v46 = vpop.permute.xlu0 %325 }
 0x2d2   :  { %429 = vst.msk [vmem:[%s787_s5 + $0x64] sm:$0xf] %vm201_vm1, %v294_v45  ;;  %436 = vst.msk [vmem:[%s787_s5 + $0x80] sm:$0xf] %vm201_vm1, %v326_v46 }
 0x2d5   :  { %v311_v47 = vpop.permute.xlu1 %310  ;;  %v343_v48 = vpop.permute.xlu0 %342 }
 0x2d6   :  { %433 = vst.msk [vmem:[%s787_s5 + $0x74] sm:$0xf] %vm201_vm1, %v311_v47  ;;  %440 = vst.msk [vmem:[%s787_s5 + $0x90] sm:$0xf] %vm201_vm1, %v343_v48 }
 0x2d9   :  { %v328_v49 = vpop.permute.xlu1 %327  ;;  %v360_v50 = vpop.permute.xlu0 %359 }
 0x2da   :  { %437 = vst.msk [vmem:[%s787_s5 + $0x84] sm:$0xf] %vm201_vm1, %v328_v49  ;;  %444 = vst.msk [vmem:[%s787_s5 + $0xa0] sm:$0xf] %vm201_vm1, %v360_v50 }
 0x2dd   :  { %v345_v51 = vpop.permute.xlu1 %344  ;;  %v377_v52 = vpop.permute.xlu0 %376 }
 0x2de   :  { %441 = vst.msk [vmem:[%s787_s5 + $0x94] sm:$0xf] %vm201_vm1, %v345_v51  ;;  %448 = vst.msk [vmem:[%s787_s5 + $0xb0] sm:$0xf] %vm201_vm1, %v377_v52 }
 0x2e1   :  { %v362_v53 = vpop.permute.xlu1 %361  ;;  %v381_v54 = vpop.permute.xlu0 %380 }
 0x2e2   :  { %445 = vst.msk [vmem:[%s787_s5 + $0xa4] sm:$0xf] %vm201_vm1, %v362_v53  ;;  %450 = vst.msk [vmem:[%s787_s5 + $0xb8] sm:$0xf] %vm201_vm1, %v381_v54 }
 0x2e5   :  { %v379_v55 = vpop.permute.xlu1 %378 }
 0x2e6   :  { %449 = vst.msk [vmem:[%s787_s5 + $0xb4] sm:$0xf] %vm201_vm1, %v379_v55 }
 0x2e9   :  { %v383_v56 = vpop.permute.xlu1 %382 }
 0x2ea   :  { %451 = vst.msk [vmem:[%s787_s5 + $0xbc] sm:$0xf] %vm201_vm1, %v383_v56 }

// kernel: _lambda_.13
= control target key start
LH: loop header
LB: loop body
LE: loop exit
PB: predicated region body
PF: predicated region fallthrough
CT: control target
= control target key end

     0   :  { %vm73_vm0 = vcmask 261120   ;;  %vm470_vm1 = vcmask 257024   ;;  %s777_s2 = inlined_call_operand.vmem [shape: bf16[32,32], index: 2, kind: input, shape index: {}]   ;;  %s778_s0 = inlined_call_operand.vmem [shape: bf16[32,32], index: 0, kind: input, shape index: {}]   ;;  %s779_s1 = inlined_call_operand.vmem [shape: bf16[32,32], index: 1, kind: input, shape index: {}]   ;;  %s780_s3 = inlined_call_operand.vmem [shape: f32[1,32], index: 3, kind: input, shape index: {}, may-alias: {3,5,9}]   ;;  %s781_s6 = inlined_call_operand.vmem [shape: bf16[32,128], index: 6, kind: input, shape index: {}]   ;;  %s782_s4 = inlined_call_operand.vmem [shape: f32[1,32], index: 4, kind: input, shape index: {}]   ;;  %s783_s5 = inlined_call_operand.vmem [shape: f32[1,32], index: 5, kind: input, shape index: {}, may-alias: {3,5,9}]   ;;  %s784_s8 = inlined_call_operand.vmem [shape: bf16[128,32], index: 8, kind: input, shape index: {}]   ;;  %s785_s7 = inlined_call_operand.vmem [shape: f32[1,128], index: 7, kind: input, shape index: {}]   ;;  %s786_s9 = inlined_call_operand.vmem [shape: f32[1,32], index: 9, kind: input, shape index: {}, may-alias: {3,5,9}]   ;;  %s787_s10 = inlined_call_operand.vmem [shape: bf16[32,32], index: 10, kind: output, shape index: {}]  }
   0x1   :  { %v577_v0 = vld [vmem:[%s777_s2] sm:$0xff]   ;;  %v578_v1 = vld [vmem:[%s777_s2 + $0x8] sm:$0xff]  }
   0x2   :  { %541 = vmatprep.subr.bf16.mxu1 %v577_v0  ;;  %v579_v2 = vld [vmem:[%s778_s0] sm:$0xff]   ;;  %v580_v3 = vld [vmem:[%s778_s0 + $0x8] sm:$0xff]  }
   0x3   :  { %542 = vmatpush3.bf16.msra.mxu1 %v577_v0  ;;  %545 = vmatprep.mubr.msk.bf16.mxu1 %vm73_vm0, %v579_v2  ;;  %v522_v4 = vld [vmem:[%s779_s1 + $0x8] sm:$0xff]   ;;  %v515_v5 = vld [vmem:[%s779_s1] sm:$0xff]  }
   0x4   :  { %543 = vmatprep.subr.bf16.mxu1 %v578_v1  ;;  %v479_v6 = vld [vmem:[%s780_s3] ss:$0 sm:$0xff]  ;;  %v520_v7 = vunpack.c.l.bf16 %v522_v4  ;;  %v516_v9 = vunpack.c.l.bf16 %v515_v5  ;;  %v521_v12 = vunpack.c.h.bf16 %v522_v4  ;;  %v517_v15 = vunpack.c.h.bf16 %v515_v5  ;;  %v582_v48 = vld [vmem:[%s781_s6 + $0x8] sm:$0xff]  }
   0x5   :  { %v581_v47 = vld [vmem:[%s781_s6] sm:$0xff]  }
   0x6   :  { %v486_v63 = vld [vmem:[%s782_s4] ss:$0 sm:$0xff] }
   0x7   :  { %544 = vmatpush3.bf16.msra.mxu1 %v578_v1  ;;  %v487_v5 = vld [vmem:[%s783_s5] ss:$0 sm:$0xff] }
   0x8   :  { %549 = vmatprep.subr.bf16.mxu1 %v581_v47 }
   0xa   :  { %546 = vmatmul.mubr.msk.bf16.vlgmr.msra.gmra.mrb[0].mxu1 %vm73_vm0, %v580_v3 }
   0xb   :  { %550 = vmatpush3.bf16.msra.mxu1 %v581_v47 }
   0xc   :  { %551 = vmatprep.subr.bf16.mxu1 %v582_v48 }
   0xf   :  { %552 = vmatpush3.bf16.msra.mxu1 %v582_v48 }
  0xdd   :  { %v547_v8 = vpop.f32.mrb[0].mxu1 }
  0xde   :  { %v123_v10 = vadd.f32 %v547_v8, %v479_v6  ;;  %v114_v11 = vpop.f32.mrb[1].mxu1 }
  0xdf   :  { %v115_v13 = vadd.f32 %v479_v6, %v114_v11  ;;  %v548_v14 = vpop.f32.mrb[2].mxu1 }
  0xe0   :  { %v693_v16 = vadd.f32 %v520_v7, %v123_v10  ;;  %v126_v17 = vadd.f32 %v548_v14, %v479_v6  ;;  %v117_v18 = vpop.f32.mrb[3].mxu1 }
  0xe1   :  { %v695_v19 = vadd.f32 %v516_v9, %v115_v13  ;;  %v118_v20 = vadd.f32 %v479_v6, %v117_v18  ;;  %v583_v18 = vld [vmem:[%s784_s8] sm:$0xff]  }
  0xe2   :  { %v697_v21 = vadd.f32 %v521_v12, %v126_v17  ;;  %v147_v22 = vsel %vm73_vm0, %v693_v16, 0.0  ;;  %557 = vmatprep.subr.bf16.mxu0 %v583_v18 }
  0xe3   :  { %v701_v23 = vadd.f32 %v517_v15, %v118_v20  ;;  %148 = vadd.xlane.f32.xlu1 %v147_v22  ;;  %v141_v24 = vsel %vm73_vm0, %v695_v19, 0.0  ;;  %558 = vmatpush3.bf16.msra.mxu0 %v583_v18  ;;  %v584_v20 = vld [vmem:[%s784_s8 + $0x8] sm:$0xff]   ;;  %v585_v22 = vld [vmem:[%s784_s8 + $0x10] sm:$0xff]  }
  0xe4   :  { %142 = vadd.xlane.f32.xlu0 %v141_v24  ;;  %v150_v25 = vsel %vm73_vm0, %v697_v21, 0.0  ;;  %559 = vmatprep.subr.bf16.mxu0 %v584_v20  ;;  %v586_v24 = vld [vmem:[%s784_s8 + $0x18] sm:$0xff]  }
  0xe5   :  { %v144_v26 = vsel %vm73_vm0, %v701_v23, 0.0 }
  0xe7   :  { %151 = vadd.xlane.f32.xlu1 %v150_v25  ;;  %560 = vmatpush3.bf16.msra.mxu0 %v584_v20  ;;  %v587_v25 = vld [vmem:[%s784_s8 + $0x20] sm:$0xff]  }
  0xe8   :  { %145 = vadd.xlane.f32.xlu0 %v144_v26  ;;  %561 = vmatprep.subr.bf16.mxu0 %v585_v22  ;;  %v588_v26 = vld [vmem:[%s784_s8 + $0x28] sm:$0xff]  }
  0xeb   :  { %562 = vmatpush3.bf16.msra.mxu0 %v585_v22 }
  0xec   :  { %563 = vmatprep.subr.bf16.mxu0 %v586_v24 }
  0xef   :  { %564 = vmatpush3.bf16.msra.mxu0 %v586_v24 }
  0xf0   :  { %565 = vmatprep.subr.bf16.mxu0 %v587_v25 }
  0xf3   :  { %566 = vmatpush3.bf16.msra.mxu0 %v587_v25 }
  0xf4   :  { %567 = vmatprep.subr.bf16.mxu0 %v588_v26 }
  0xf7   :  { %568 = vmatpush3.bf16.msra.mxu0 %v588_v26 }
 0x170   :  { %v149_v27 = vpop.xlane.xlu1 %148 }
 0x171   :  { %v156_v28 = vmul.f32 0.03125, %v149_v27  ;;  %v143_v29 = vpop.xlane.xlu0 %142  ;;  %v589_v27 = vld [vmem:[%s784_s8 + $0x30] sm:$0xff]  }
 0x172   :  { %v154_v30 = vmul.f32 0.03125, %v143_v29  ;;  %569 = vmatprep.subr.bf16.mxu0 %v589_v27  ;;  %v488_v29 = vld [vmem:[%s785_s7] ss:$0 sm:$0xff] }
 0x173   :  { %v160_v31 = vsub.f32 %v693_v16, %v156_v28  ;;  %570 = vmatpush3.bf16.msra.mxu0 %v589_v27  ;;  %v590_v28 = vld [vmem:[%s784_s8 + $0x38] sm:$0xff]  }
 0x174   :  { %v158_v32 = vsub.f32 %v695_v19, %v154_v30  ;;  %v152_v33 = vpop.xlane.xlu1 %151  ;;  %571 = vmatprep.subr.bf16.mxu0 %v590_v28 }
 0x175   :  { %v157_v34 = vmul.f32 0.03125, %v152_v33  ;;  %v146_v35 = vpop.xlane.xlu0 %145  ;;  %v164_v41 = vmul.f32 %v160_v31, %v160_v31 }
 0x176   :  { %v155_v36 = vmul.f32 0.03125, %v146_v35  ;;  %v162_v37 = vmul.f32 %v158_v32, %v158_v32 }
 0x177   :  { %v161_v38 = vsub.f32 %v697_v21, %v157_v34  ;;  %v172_v43 = vsel %vm73_vm0, %v164_v41, 0.0  ;;  %572 = vmatpush3.bf16.msra.mxu0 %v590_v28 }
 0x178   :  { %v159_v39 = vsub.f32 %v701_v23, %v155_v36  ;;  %v166_v40 = vsel %vm73_vm0, %v162_v37, 0.0 }
 0x179   :  { %167 = vadd.xlane.f32.xlu0 %v166_v40  ;;  %v165_v45 = vmul.f32 %v161_v38, %v161_v38 }
 0x17a   :  { %v163_v42 = vmul.f32 %v159_v39, %v159_v39 }
 0x17b   :  { %v175_v46 = vsel %vm73_vm0, %v165_v45, 0.0 }
 0x17c   :  { %v169_v44 = vsel %vm73_vm0, %v163_v42, 0.0 }
 0x17d   :  { %173 = vadd.xlane.f32.xlu0 %v172_v43  ;;  %170 = vadd.xlane.f32.xlu1 %v169_v44 }
 0x181   :  { %176 = vadd.xlane.f32.xlu1 %v175_v46 }
 0x206   :  { %v168_v49 = vpop.xlane.xlu0 %167 }
 0x207   :  { %v178_v50 = vmul.f32 0.03125, %v168_v49 }
 0x209   :  { %v182_v51 = vadd.f32 1e-05, %v178_v50 }
 0x20a   :  { %v171_v52 = vpop.xlane.xlu1 %170  ;;  %v174_v53 = vpop.xlane.xlu0 %173 }
 0x20b   :  { %591 = vrsqrt.f32 %v182_v51  ;;  %v179_v54 = vmul.f32 0.03125, %v171_v52  ;;  %v180_v55 = vmul.f32 0.03125, %v174_v53 }
 0x20d   :  { %v183_v56 = vadd.f32 1e-05, %v179_v54  ;;  %v184_v57 = vadd.f32 1e-05, %v180_v55 }
 0x20e   :  { %v177_v58 = vpop.xlane.xlu1 %176 }
 0x20f   :  { %593 = vrsqrt.f32 %v183_v56  ;;  %v181_v59 = vmul.f32 0.03125, %v177_v58 }
 0x210   :  { %595 = vrsqrt.f32 %v184_v57 }
 0x211   :  { %v185_v60 = vadd.f32 1e-05, %v181_v59 }
 0x213   :  { %597 = vrsqrt.f32 %v185_v60 }
 0x215   :  { %v592_v61 = vpop.eup %591 }
 0x216   :  { %v190_v62 = vmul.f32 %v592_v61, %v158_v32 }
 0x218   :  { %v201_v3 = vmul.f32 %v486_v63, %v190_v62 }
 0x219   :  { %v594_v0 = vpop.eup %593 }
 0x21a   :  { %v596_v1 = vpop.eup %595  ;;  %v191_v2 = vmul.f32 %v594_v0, %v159_v39  ;;  %v212_v10 = vadd.f32 %v487_v5, %v201_v3  ;;  %v497_v0 = vld [vmem:[%s786_s9] ss:$0 sm:$0xff] }
 0x21b   :  { %v192_v4 = vmul.f32 %v596_v1, %v160_v31 }
 0x21c   :  { %v202_v6 = vmul.f32 %v486_v63, %v191_v2 }
 0x21d   :  { %v598_v7 = vpop.eup %597  ;;  %v203_v8 = vmul.f32 %v486_v63, %v192_v4 }
 0x21e   :  { %v193_v9 = vmul.f32 %v598_v7, %v161_v38  ;;  %v213_v11 = vadd.f32 %v487_v5, %v202_v6 }
 0x21f   :  { %v214_v14 = vadd.f32 %v487_v5, %v203_v8 }
 0x220   :  { %v204_v12 = vmul.f32 %v486_v63, %v193_v9  ;;  %v216_v13 = vpack.c.bf16 %v213_v11, %v212_v10 }
 0x222   :  { %553 = vmatprep.mubr.msk.bf16.mxu1 %vm73_vm0, %v216_v13  ;;  %v215_v15 = vadd.f32 %v487_v5, %v204_v12 }
 0x224   :  { %v217_v17 = vpack.c.bf16 %v215_v15, %v214_v14 }
 0x226   :  { %554 = vmatmul.mubr.msk.bf16.vlgmr.msra.gmra.mrb[4].mxu1 %vm73_vm0, %v217_v17 }
 0x2f9   :  { %v555_v30 = vpop.f32.mrb[4].mxu1 }
 0x2fa   :  { %v290_v31 = vadd.f32 %v555_v30, %v488_v29  ;;  %v281_v32 = vpop.f32.mrb[5].mxu1 }
 0x2fb   :  { %v282_v33 = vadd.f32 %v488_v29, %v281_v32  ;;  %v556_v34 = vpop.f32.mrb[6].mxu1 }
 0x2fc   :  { %v495_v35 = vmul.f32 -1.702, %v290_v31  ;;  %v293_v36 = vadd.f32 %v556_v34, %v488_v29  ;;  %v284_v37 = vpop.f32.mrb[7].mxu1 }
 0x2fd   :  { %v493_v38 = vmul.f32 -1.702, %v282_v33  ;;  %v285_v39 = vadd.f32 %v488_v29, %v284_v37 }
 0x2fe   :  { %v308_v40 = vmul.f32 1.442695, %v495_v35  ;;  %v496_v41 = vmul.f32 -1.702, %v293_v36 }
 0x2ff   :  { %v304_v42 = vmul.f32 1.442695, %v493_v38  ;;  %v494_v43 = vmul.f32 -1.702, %v285_v39 }
 0x300   :  { %599 = vpow2.f32 %v308_v40  ;;  %v310_v44 = vmul.f32 1.442695, %v496_v41 }
 0x301   :  { %601 = vpow2.f32 %v304_v42  ;;  %v306_v45 = vmul.f32 1.442695, %v494_v43 }
 0x302   :  { %603 = vpow2.f32 %v310_v44 }
 0x303   :  { %605 = vpow2.f32 %v306_v45 }
 0x30a   :  { %v600_v46 = vpop.eup %599 }
 0x30b   :  { %v602_v47 = vpop.eup %601  ;;  %v314_v48 = vadd.f32 1.0, %v600_v46 }
 0x30c   :  { %v604_v49 = vpop.eup %603  ;;  %v312_v50 = vadd.f32 1.0, %v602_v47 }
 0x30d   :  { %v606_v51 = vpop.eup %605  ;;  %607 = vrcp.f32 %v314_v48  ;;  %v315_v52 = vadd.f32 1.0, %v604_v49 }
 0x30e   :  { %609 = vrcp.f32 %v312_v50  ;;  %v313_v53 = vadd.f32 1.0, %v606_v51 }
 0x30f   :  { %611 = vrcp.f32 %v315_v52 }
 0x310   :  { %613 = vrcp.f32 %v313_v53 }
 0x317   :  { %v608_v54 = vpop.eup %607 }
 0x318   :  { %v610_v55 = vpop.eup %609  ;;  %v326_v58 = vmul.f32 %v608_v54, %v290_v31 }
 0x319   :  { %v612_v56 = vpop.eup %611  ;;  %v324_v60 = vmul.f32 %v610_v55, %v282_v33 }
 0x31a   :  { %v614_v57 = vpop.eup %613  ;;  %v327_v59 = vmul.f32 %v612_v56, %v293_v36 }
 0x31b   :  { %v325_v61 = vmul.f32 %v614_v57, %v285_v39 }
 0x31c   :  { %v329_v62 = vpack.c.bf16 %v327_v59, %v326_v58 }
 0x31d   :  { %v328_v63 = vpack.c.bf16 %v325_v61, %v324_v60 }
 0x31f   :  { %573 = vmatprep.mubr.bf16.mxu0 %v328_v63 }
 0x320   :  { %574 = vmatmul.mubr.bf16.vlgmr.msra.gmra.mrb[0].mxu0 %v329_v62 }
 0x3f3   :  { %v575_v1 = vpop.f32.mrb[0].mxu0 }
 0x3f4   :  { %v444_v2 = vadd.f32 %v575_v1, %v497_v0  ;;  %v435_v3 = vpop.f32.mrb[1].mxu0 }
 0x3f5   :  { %v436_v4 = vadd.f32 %v497_v0, %v435_v3  ;;  %v576_v5 = vpop.f32.mrb[2].mxu0 }
 0x3f6   :  { %v452_v6 = vadd.f32 %v444_v2, %v693_v16  ;;  %v447_v7 = vadd.f32 %v576_v5, %v497_v0  ;;  %v438_v8 = vpop.f32.mrb[3].mxu0 }
 0x3f7   :  { %v450_v9 = vadd.f32 %v436_v4, %v695_v19  ;;  %v439_v10 = vadd.f32 %v497_v0, %v438_v8 }
 0x3f8   :  { %v512_v11 = vpack.c.bf16 %v452_v6, %v452_v6  ;;  %v453_v12 = vadd.f32 %v447_v7, %v697_v21 }
 0x3f9   :  { %v510_v13 = vpack.c.bf16 %v450_v9, %v450_v9  ;;  %v451_v14 = vadd.f32 %v439_v10, %v701_v23 }
 0x3fa   :  { %473 = vst.msk [vmem:[%s787_s10 + $0x8] sm:$0xf] %vm470_vm1, %v512_v11  ;;  %v513_v15 = vpack.c.bf16 %v453_v12, %v453_v12 }
 0x3fb   :  { %471 = vst.msk [vmem:[%s787_s10] sm:$0xf] %vm470_vm1, %v510_v13  ;;  %v511_v16 = vpack.c.bf16 %v451_v14, %v451_v14 }
 0x3fc   :  { %474 = vst.msk [vmem:[%s787_s10 + $0xc] sm:$0xf] %vm470_vm1, %v513_v15 }
 0x3fd   :  { %472 = vst.msk [vmem:[%s787_s10 + $0x4] sm:$0xf] %vm470_vm1, %v511_v16 }

// kernel: _lambda_.17
= control target key start
LH: loop header
LB: loop body
LE: loop exit
PB: predicated region body
PF: predicated region fallthrough
CT: control target
= control target key end

     0   :  { %vm23_vm0 = vcmask 259072   ;;  %v150_v9 = vmov 0.0   ;;  %vm151_vm1 = vmmov 0   ;;  %vm78_vm2 = vcmask 261120   ;;  %s203_s0 = inlined_call_operand.vmem [shape: bf16[6,32], index: 0, kind: input, shape index: {}]   ;;  %s204_s3 = inlined_call_operand.vmem [shape: bf16[32,128], index: 3, kind: input, shape index: {}]   ;;  %s205_s1 = inlined_call_operand.vmem [shape: f32[1,32], index: 1, kind: input, shape index: {}]   ;;  %s206_s2 = inlined_call_operand.vmem [shape: f32[1,32], index: 2, kind: input, shape index: {}]   ;;  %s207_s4 = inlined_call_operand.vmem [shape: f32[1,128], index: 4, kind: input, shape index: {}]   ;;  %s208_s5 = inlined_call_operand.vmem [shape: f32[6,128], index: 5, kind: output, shape index: {}]  }
   0x1   :  { %v21_v0 = vld [vmem:[%s203_s0] sm:$0x7]  ;;  %136 = vmatprep.subr.bf16.mxu0 %v150_v9  ;;  %v147_v10 = vld [vmem:[%s204_s3 + $0x8] sm:$0xff]   ;;  %140 = vmatprep.mubr.msk.bf16.mxu0 %vm151_vm1, %v150_v9 }
   0x2   :  { %v22_v1 = vunpack.c.l.bf16 %v21_v0  ;;  %v146_v8 = vld [vmem:[%s204_s3] sm:$0xff]  }
   0x3   :  { %137 = vmatpush3.bf16.msra.mxu0 %v146_v8  ;;  %v127_v15 = vld [vmem:[%s205_s1] ss:$0 sm:$0xff] }
   0x4   :  { %v24_v2 = vsel %vm23_vm0, %v22_v1, 0.0  ;;  %138 = vmatprep.subr.bf16.mxu0 %v150_v9  ;;  %v128_v17 = vld [vmem:[%s206_s2] ss:$0 sm:$0xff] }
   0x5   :  { %25 = vadd.xlane.f32.xlu0 %v24_v2  ;;  %v129_v21 = vld [vmem:[%s207_s4] ss:$0 sm:$0xff] }
   0x7   :  { %139 = vmatpush3.bf16.msra.mxu0 %v147_v10 }
  0x92   :  { %v26_v3 = vpop.xlane.xlu0 %25 }
  0x93   :  { %v28_v4 = vmul.f32 0.03125, %v26_v3 }
  0x95   :  { %v29_v5 = vsub.f32 %v22_v1, %v28_v4 }
  0x97   :  { %v30_v6 = vmul.f32 %v29_v5, %v29_v5 }
  0x99   :  { %v31_v7 = vsel %vm23_vm0, %v30_v6, 0.0 }
  0x9a   :  { %32 = vadd.xlane.f32.xlu0 %v31_v7 }
 0x127   :  { %v33_v11 = vpop.xlane.xlu0 %32 }
 0x128   :  { %v34_v12 = vmul.f32 0.03125, %v33_v11 }
 0x12a   :  { %v35_v13 = vadd.f32 1e-05, %v34_v12 }
 0x12c   :  { %148 = vrsqrt.f32 %v35_v13 }
 0x136   :  { %v149_v14 = vpop.eup %148 }
 0x137   :  { %v37_v16 = vmul.f32 %v149_v14, %v29_v5 }
 0x139   :  { %v45_v18 = vmul.f32 %v127_v15, %v37_v16 }
 0x13b   :  { %v53_v19 = vadd.f32 %v128_v17, %v45_v18 }
 0x13d   :  { %v54_v20 = vpack.c.bf16 %v53_v19, %v53_v19 }
 0x13f   :  { %141 = vmatmul.mubr.msk.bf16.vlgmr.msra.gmra.mrb[0].mxu0 %vm78_vm2, %v54_v20 }
 0x212   :  { %v116_v22 = vpop.f32.mrb[0].mxu0 }
 0x213   :  { %v117_v23 = vadd.f32 %v129_v21, %v116_v22  ;;  %v142_v24 = vpop.f32.mrb[1].mxu0 }
 0x214   :  { %v119_v25 = vpop.f32.mrb[2].mxu0 }
 0x215   :  { %122 = vst [vmem:[%s208_s5] sm:$0x3f] %v117_v23  ;;  %v143_v26 = vpop.f32.mrb[3].mxu0 }

</bundles_post_ra>
